<compile_context>
chip_gen: v7x
topology: tpu7x:2x2x1
jax: 0.10.0
libtpu: 0.0.40
codegen_flags: <defaults>
</compile_context>

<pallas_src>
import jax
import jax.numpy as jnp
import numpy as np
from jax import lax
from jax.experimental import pallas as pl
from jax.experimental.pallas import tpu as pltpu

# ---- static kernel geometry -------------------------------------------------
PH = 6     # H halo on each side (13 // 2)
PWL = 8    # W halo, left: 8 >= 6 so the interior store starts sublane-aligned
PWR = 6    # W halo, right
RA = 4     # padded rows processed per Phase-A iteration
RB = 4     # output rows produced per Phase-B iteration
CC = 128   # lane (channel) chunk processed at a time inside the kernel


def _round_up(x, m):
    return -(-x // m) * m


def _min_value(dtype):
    dtype = np.dtype(dtype)
    if jnp.issubdtype(dtype, jnp.floating):
        return float("-inf")
    if jnp.issubdtype(dtype, jnp.integer):
        return int(jnp.iinfo(dtype).min)
    raise ValueError(f"unsupported dtype for max pooling: {dtype}")


def _spp_kernel(x_ref, o_ref, pad_ref, w5_ref, w9_ref, w13_ref):
    # x_ref   : (1, H, W, Cb)       channels-last input tile (lanes = channels)
    # o_ref   : (1, 4, H, W, Cb)    branches [pool13, pool9, pool5, identity]
    # pad_ref : (HP, W+14, Cb)      dtype-min padded copy of the tile
    # w*_ref  : (HP, W, Cb)         per-row W-direction sliding maxima (5/9/13)
    _, h, w, cb = x_ref.shape
    hp, wp, _ = pad_ref.shape
    dt = x_ref.dtype
    neg = _min_value(dt)

    cc = CC if cb % CC == 0 else cb          # one lane tile per inner chunk
    rb = min(RB, h)
    nb = -(-h // rb)

    # Static channel-chunk loop (the big values inside are bounded by the
    # row-chunk fori_loops below, so nothing large lives across iterations).
    for cs in range(0, cb, cc):
        lanes = pl.ds(cs, cc)

        # Refresh only the halo *strips* (not the whole buffer); the interior
        # is fully rewritten each step.  Per-step rather than pl.when(first):
        # under megacore each core has its own scratch.
        pad_ref[0:PH, :, lanes] = jnp.full((PH, wp, cc), neg, dt)
        pad_ref[PH + h:hp, :, lanes] = jnp.full((hp - PH - h, wp, cc), neg, dt)
        pad_ref[PH:PH + h, 0:PWL, lanes] = jnp.full((h, PWL, cc), neg, dt)
        pad_ref[PH:PH + h, PWL + w:wp, lanes] = (
            jnp.full((h, wp - PWL - w, cc), neg, dt))
        # Interior: sublane offset 8 (aligned), full lane width (unmasked).
        pad_ref[PH:PH + h, PWL:PWL + w, lanes] = x_ref[0, :, :, lanes]

        # -- Phase A: W-direction (sublane) sliding maxima, composed 5->9->13,
        #    processed RA padded rows at a time and staged in VMEM buffers.
        def phase_a(a, carry):
            r0 = a * RA
            v1 = pad_ref[pl.ds(r0, RA), pl.ds(0, w + 10), lanes]
            for d in range(1, 5):
                v1 = jnp.maximum(
                    v1, pad_ref[pl.ds(r0, RA), pl.ds(d, w + 10), lanes])
            w5_ref[pl.ds(r0, RA), :, lanes] = v1[:, 6:6 + w, :]        # win 5
            v2 = v1[:, 0:w + 6, :]
            for d in range(1, 5):
                v2 = jnp.maximum(v2, v1[:, d:d + w + 6, :])
            w9_ref[pl.ds(r0, RA), :, lanes] = v2[:, 4:4 + w, :]        # win 9
            v3 = v2[:, 0:w + 2, :]
            for d in range(1, 5):
                v3 = jnp.maximum(v3, v2[:, d:d + w + 2, :])
            w13_ref[pl.ds(r0, RA), :, lanes] = v3[:, 2:2 + w, :]       # win 13
            return carry

        lax.fori_loop(0, hp // RA, phase_a, 0)

        # -- Phase B: H-direction taps + lane-dense stores of all 4 branches.
        def phase_b(b, carry):
            start = jnp.minimum(b * rb, h - rb)   # last chunk overlaps (idempotent)

            def hmax(buf, off, taps):
                r = buf[pl.ds(start + off, rb), :, lanes]
                for d in range(1, taps):
                    r = jnp.maximum(r, buf[pl.ds(start + off + d, rb), :, lanes])
                return r

            rows = pl.ds(start, rb)
            o_ref[0, 0, rows, :, lanes] = hmax(w13_ref, 0, 13)  # MaxPool2d(13,1,6)
            o_ref[0, 1, rows, :, lanes] = hmax(w9_ref, 2, 9)    # MaxPool2d(9,1,4)
            o_ref[0, 2, rows, :, lanes] = hmax(w5_ref, 4, 5)    # MaxPool2d(5,1,2)
            o_ref[0, 3, rows, :, lanes] = x_ref[0, rows, :, lanes]  # identity
            return carry

        lax.fori_loop(0, nb, phase_b, 0)


def _vmem_bytes(h, w, cb, dtype):
    """Rough per-step VMEM need ((8,128)-tile rounded), incl. double buffering."""
    item = np.dtype(dtype).itemsize

    def tiled(lead, s, l):
        return lead * _round_up(s, 8) * _round_up(l, 128) * item

    hp = _round_up(h + 2 * PH, RA)
    wp = w + PWL + PWR
    in_blk = tiled(h, w, cb)
    out_blk = tiled(4 * h, w, cb)
    scratch = tiled(hp, wp, cb) + 3 * tiled(hp, w, cb)
    return 2 * in_blk + 2 * out_blk + scratch


def _pick_c_block(n, c, h, w, dtype, vmem_budget=40 << 20):
    """Largest legal channel block fitting a v7x-safe VMEM budget; when N == 1
    split channels so the grid has >= 2 'parallel' steps (two TensorCores)."""
    def legal(cb):
        return cb == c or (cb % CC == 0 and c % cb == 0)

    cb = c
    if n == 1 and c % (2 * CC) == 0:
        cb = c // 2
    while _vmem_bytes(h, w, cb, dtype) > vmem_budget:
        nxt = cb // 2
        if nxt >= CC and legal(nxt):
            cb = nxt
        else:
            break
    return cb


def spatial_pyramid_pooling_nhwc(x_nhwc, c_block=None, out_buffers=2):
    """Channels-last core.  Returns (N, 4, H, W, C) with branches ordered
    [pool13, pool9, pool5, identity] (== torch.cat order)."""
    n, h, w, c = x_nhwc.shape
    if c_block is None:
        c_block = _pick_c_block(n, c, h, w, x_nhwc.dtype)
    assert c % c_block == 0 and (c_block == c or c_block % CC == 0), c_block

    hp = _round_up(h + 2 * PH, RA)
    wp = w + PWL + PWR
    vmem_limit = int(min(48 << 20, max(32 << 20,
                                       _vmem_bytes(h, w, c_block, x_nhwc.dtype)
                                       + (8 << 20))))

    out_kwargs = {}
    if out_buffers != 2:          # optional deeper writeback pipelining
        out_kwargs["pipeline_mode"] = pl.Buffered(out_buffers)
    out_spec = pl.BlockSpec((1, 4, h, w, c_block),
                            lambda i, j: (i, 0, 0, 0, j), **out_kwargs)

    return pl.pallas_call(
        _spp_kernel,
        out_shape=jax.ShapeDtypeStruct((n, 4, h, w, c), x_nhwc.dtype),
        grid_spec=pltpu.PrefetchScalarGridSpec(
            num_scalar_prefetch=0,
            grid=(n, c // c_block),
            in_specs=[pl.BlockSpec((1, h, w, c_block),
                                   lambda i, j: (i, 0, 0, j))],
            out_specs=out_spec,
            scratch_shapes=[
                pltpu.VMEM((hp, wp, c_block), x_nhwc.dtype),   # padded input
                pltpu.VMEM((hp, w, c_block), x_nhwc.dtype),    # W-max, win 5
                pltpu.VMEM((hp, w, c_block), x_nhwc.dtype),    # W-max, win 9
                pltpu.VMEM((hp, w, c_block), x_nhwc.dtype),    # W-max, win 13
            ]),
        compiler_params=pltpu.CompilerParams(
            dimension_semantics=("parallel", "parallel"),
            vmem_limit_bytes=vmem_limit),
    )(x_nhwc)


def spatial_pyramid_pooling(x_nchw, c_block=None, out_buffers=2):
    """NCHW in / NCHW out wrapper matching the PyTorch module's interface."""
    n, c, h, w = x_nchw.shape
    x_nhwc = jnp.transpose(x_nchw, (0, 2, 3, 1))
    out = spatial_pyramid_pooling_nhwc(x_nhwc, c_block=c_block,
                                       out_buffers=out_buffers)
    # (N,4,H,W,C) -> (N,4,C,H,W) -> (N,4C,H,W): merging (4, C) branch-major
    # reproduces torch.cat([p13, p9, p5, x], dim=1) channel order.
    return jnp.transpose(out, (0, 1, 4, 2, 3)).reshape(n, 4 * c, h, w)


def reference_spp(x_nchw, pool_sizes=(13, 9, 5)):
    def maxpool_same(v, k):
        p = k // 2
        return lax.reduce_window(
            v, -jnp.inf, lax.max,
            window_dimensions=(1, 1, k, k),
            window_strides=(1, 1, 1, 1),
            padding=((0, 0), (0, 0), (p, p), (p, p)))
    feats = [maxpool_same(x_nchw, k) for k in pool_sizes]
    return jnp.concatenate(feats + [x_nchw], axis=1)


if __name__ == "__main__":
    key = jax.random.PRNGKey(0)
    N, C, H, W = 2, 4, 16, 16
    x = jax.random.normal(key, (N, C, H, W), dtype=jnp.float32)

    spp = jax.jit(spatial_pyramid_pooling)
    out = jax.block_until_ready(spp(x))
    ref = jax.block_until_ready(reference_spp(x))

    assert out.shape == (N, 4 * C, H, W), out.shape
    np.testing.assert_allclose(np.asarray(out), np.asarray(ref), rtol=0, atol=0)
    print("KERNEL_OK")
</pallas_src>

<mosaic_0001>
module attributes {stable_mosaic.version = 11 : i64} {
  func.func @_spp_kernel(%arg0: i32, %arg1: i32, %arg2: memref<1x16x16x4xf32, #tpu.memory_space<vmem>>, %arg3: memref<1x4x16x16x4xf32, #tpu.memory_space<vmem>>, %arg4: memref<28x30x4xf32, #tpu.memory_space<vmem>>, %arg5: memref<28x16x4xf32, #tpu.memory_space<vmem>>, %arg6: memref<28x16x4xf32, #tpu.memory_space<vmem>>, %arg7: memref<28x16x4xf32, #tpu.memory_space<vmem>>) attributes {dimension_semantics = [#tpu.dimension_semantics<parallel>, #tpu.dimension_semantics<parallel>], iteration_bounds = array<i64: 2, 1>, scalar_prefetch = 0 : i64, scratch_operands = 4 : i64, tpu.core_type = #tpu.core_type<tc>, window_params = [{transform_indices = @transform_0, window_bounds = array<i64: 1, 16, 16, 4>}, {transform_indices = @transform_1, window_bounds = array<i64: 1, 4, 16, 16, 4>}]} {
    %cst = arith.constant 0xFF800000 : f32
    %0 = vector.broadcast %cst : f32 to vector<6x30x4xf32>
    %c0 = arith.constant 0 : index
    %c0_0 = arith.constant 0 : index
    %c0_1 = arith.constant 0 : index
    %1 = vector.load %arg4[%c0, %c0_0, %c0_1] : memref<28x30x4xf32, #tpu.memory_space<vmem>>, vector<6x30x4xf32>
    tpu.vector_store %arg4[%c0, %c0_0, %c0_1], %0 {strides = array<i32>} : memref<28x30x4xf32, #tpu.memory_space<vmem>>, vector<6x30x4xf32>,
    %cst_2 = arith.constant 0xFF800000 : f32
    %2 = vector.broadcast %cst_2 : f32 to vector<6x30x4xf32>
    %c22 = arith.constant 22 : index
    %c0_3 = arith.constant 0 : index
    %c0_4 = arith.constant 0 : index
    %3 = vector.load %arg4[%c22, %c0_3, %c0_4] : memref<28x30x4xf32, #tpu.memory_space<vmem>>, vector<6x30x4xf32>
    tpu.vector_store %arg4[%c22, %c0_3, %c0_4], %2 {strides = array<i32>} : memref<28x30x4xf32, #tpu.memory_space<vmem>>, vector<6x30x4xf32>,
    %cst_5 = arith.constant 0xFF800000 : f32
    %4 = vector.broadcast %cst_5 : f32 to vector<16x8x4xf32>
    %c6 = arith.constant 6 : index
    %c0_6 = arith.constant 0 : index
    %c0_7 = arith.constant 0 : index
    %5 = vector.load %arg4[%c6, %c0_6, %c0_7] : memref<28x30x4xf32, #tpu.memory_space<vmem>>, vector<16x8x4xf32>
    tpu.vector_store %arg4[%c6, %c0_6, %c0_7], %4 {strides = array<i32>} : memref<28x30x4xf32, #tpu.memory_space<vmem>>, vector<16x8x4xf32>,
    %cst_8 = arith.constant 0xFF800000 : f32
    %6 = vector.broadcast %cst_8 : f32 to vector<16x6x4xf32>
    %c6_9 = arith.constant 6 : index
    %c24 = arith.constant 24 : index
    %c0_10 = arith.constant 0 : index
    %7 = vector.load %arg4[%c6_9, %c24, %c0_10] : memref<28x30x4xf32, #tpu.memory_space<vmem>>, vector<16x6x4xf32>
    tpu.vector_store %arg4[%c6_9, %c24, %c0_10], %6 {strides = array<i32>} : memref<28x30x4xf32, #tpu.memory_space<vmem>>, vector<16x6x4xf32>,
    %c0_11 = arith.constant 0 : index
    %c0_12 = arith.constant 0 : index
    %c0_13 = arith.constant 0 : index
    %c0_14 = arith.constant 0 : index
    %8 = vector.load %arg2[%c0_11, %c0_12, %c0_13, %c0_14] : memref<1x16x16x4xf32, #tpu.memory_space<vmem>>, vector<1x16x16x4xf32>
    %9 = vector.shape_cast %8 : vector<1x16x16x4xf32> to vector<16x16x4xf32>
    %c6_15 = arith.constant 6 : index
    %c8 = arith.constant 8 : index
    %c0_16 = arith.constant 0 : index
    %10 = vector.load %arg4[%c6_15, %c8, %c0_16] : memref<28x30x4xf32, #tpu.memory_space<vmem>>, vector<16x16x4xf32>
    tpu.vector_store %arg4[%c6_15, %c8, %c0_16], %9 {strides = array<i32>} : memref<28x30x4xf32, #tpu.memory_space<vmem>>, vector<16x16x4xf32>,
    %c0_i32 = arith.constant 0 : i32
    %c7_i32 = arith.constant 7 : i32
    %11 = arith.addi %c0_i32, %c7_i32 : i32
    %c1_i32 = arith.constant 1 : i32
    scf.for %arg8 = %c0_i32 to %11 step %c1_i32  : i32 {
      %c4_i32_21 = arith.constant 4 : i32
      %13 = arith.muli %arg8, %c4_i32_21 : i32
      %14 = arith.index_cast %13 : i32 to index
      %c0_22 = arith.constant 0 : index
      %c0_23 = arith.constant 0 : index
      %15 = vector.load %arg4[%14, %c0_22, %c0_23] : memref<28x30x4xf32, #tpu.memory_space<vmem>>, vector<4x26x4xf32>
      %16 = arith.index_cast %13 : i32 to index
      %c1 = arith.constant 1 : index
      %c0_24 = arith.constant 0 : index
      %17 = vector.load %arg4[%16, %c1, %c0_24] : memref<28x30x4xf32, #tpu.memory_space<vmem>>, vector<4x26x4xf32>
      %18 = arith.maximumf %15, %17 : vector<4x26x4xf32>
      %19 = arith.index_cast %13 : i32 to index
      %c2 = arith.constant 2 : index
      %c0_25 = arith.constant 0 : index
      %20 = vector.load %arg4[%19, %c2, %c0_25] : memref<28x30x4xf32, #tpu.memory_space<vmem>>, vector<4x26x4xf32>
      %21 = arith.maximumf %18, %20 : vector<4x26x4xf32>
      %22 = arith.index_cast %13 : i32 to index
      %c3 = arith.constant 3 : index
      %c0_26 = arith.constant 0 : index
      %23 = vector.load %arg4[%22, %c3, %c0_26] : memref<28x30x4xf32, #tpu.memory_space<vmem>>, vector<4x26x4xf32>
      %24 = arith.maximumf %21, %23 : vector<4x26x4xf32>
      %25 = arith.index_cast %13 : i32 to index
      %c4 = arith.constant 4 : index
      %c0_27 = arith.constant 0 : index
      %26 = vector.load %arg4[%25, %c4, %c0_27] : memref<28x30x4xf32, #tpu.memory_space<vmem>>, vector<4x26x4xf32>
      %27 = arith.maximumf %24, %26 : vector<4x26x4xf32>
      %28 = vector.extract_strided_slice %27 {offsets = [0, 6, 0], sizes = [4, 16, 4], strides = [1, 1, 1]} : vector<4x26x4xf32> to vector<4x16x4xf32>
      %29 = arith.index_cast %13 : i32 to index
      %c0_28 = arith.constant 0 : index
      %c0_29 = arith.constant 0 : index
      %30 = vector.load %arg5[%29, %c0_28, %c0_29] : memref<28x16x4xf32, #tpu.memory_space<vmem>>, vector<4x16x4xf32>
      tpu.vector_store %arg5[%29, %c0_28, %c0_29], %28 {strides = array<i32>} : memref<28x16x4xf32, #tpu.memory_space<vmem>>, vector<4x16x4xf32>,
      %31 = vector.extract_strided_slice %27 {offsets = [0, 0, 0], sizes = [4, 22, 4], strides = [1, 1, 1]} : vector<4x26x4xf32> to vector<4x22x4xf32>
      %32 = vector.extract_strided_slice %27 {offsets = [0, 1, 0], sizes = [4, 22, 4], strides = [1, 1, 1]} : vector<4x26x4xf32> to vector<4x22x4xf32>
      %33 = arith.maximumf %31, %32 : vector<4x22x4xf32>
      %34 = vector.extract_strided_slice %27 {offsets = [0, 2, 0], sizes = [4, 22, 4], strides = [1, 1, 1]} : vector<4x26x4xf32> to vector<4x22x4xf32>
      %35 = arith.maximumf %33, %34 : vector<4x22x4xf32>
      %36 = vector.extract_strided_slice %27 {offsets = [0, 3, 0], sizes = [4, 22, 4], strides = [1, 1, 1]} : vector<4x26x4xf32> to vector<4x22x4xf32>
      %37 = arith.maximumf %35, %36 : vector<4x22x4xf32>
      %38 = vector.extract_strided_slice %27 {offsets = [0, 4, 0], sizes = [4, 22, 4], strides = [1, 1, 1]} : vector<4x26x4xf32> to vector<4x22x4xf32>
      %39 = arith.maximumf %37, %38 : vector<4x22x4xf32>
      %40 = vector.extract_strided_slice %39 {offsets = [0, 4, 0], sizes = [4, 16, 4], strides = [1, 1, 1]} : vector<4x22x4xf32> to vector<4x16x4xf32>
      %41 = arith.index_cast %13 : i32 to index
      %c0_30 = arith.constant 0 : index
      %c0_31 = arith.constant 0 : index
      %42 = vector.load %arg6[%41, %c0_30, %c0_31] : memref<28x16x4xf32, #tpu.memory_space<vmem>>, vector<4x16x4xf32>
      tpu.vector_store %arg6[%41, %c0_30, %c0_31], %40 {strides = array<i32>} : memref<28x16x4xf32, #tpu.memory_space<vmem>>, vector<4x16x4xf32>,
      %43 = vector.extract_strided_slice %39 {offsets = [0, 0, 0], sizes = [4, 18, 4], strides = [1, 1, 1]} : vector<4x22x4xf32> to vector<4x18x4xf32>
      %44 = vector.extract_strided_slice %39 {offsets = [0, 1, 0], sizes = [4, 18, 4], strides = [1, 1, 1]} : vector<4x22x4xf32> to vector<4x18x4xf32>
      %45 = arith.maximumf %43, %44 : vector<4x18x4xf32>
      %46 = vector.extract_strided_slice %39 {offsets = [0, 2, 0], sizes = [4, 18, 4], strides = [1, 1, 1]} : vector<4x22x4xf32> to vector<4x18x4xf32>
      %47 = arith.maximumf %45, %46 : vector<4x18x4xf32>
      %48 = vector.extract_strided_slice %39 {offsets = [0, 3, 0], sizes = [4, 18, 4], strides = [1, 1, 1]} : vector<4x22x4xf32> to vector<4x18x4xf32>
      %49 = arith.maximumf %47, %48 : vector<4x18x4xf32>
      %50 = vector.extract_strided_slice %39 {offsets = [0, 4, 0], sizes = [4, 18, 4], strides = [1, 1, 1]} : vector<4x22x4xf32> to vector<4x18x4xf32>
      %51 = arith.maximumf %49, %50 : vector<4x18x4xf32>
      %52 = vector.extract_strided_slice %51 {offsets = [0, 2, 0], sizes = [4, 16, 4], strides = [1, 1, 1]} : vector<4x18x4xf32> to vector<4x16x4xf32>
      %53 = arith.index_cast %13 : i32 to index
      %c0_32 = arith.constant 0 : index
      %c0_33 = arith.constant 0 : index
      %54 = vector.load %arg7[%53, %c0_32, %c0_33] : memref<28x16x4xf32, #tpu.memory_space<vmem>>, vector<4x16x4xf32>
      tpu.vector_store %arg7[%53, %c0_32, %c0_33], %52 {strides = array<i32>} : memref<28x16x4xf32, #tpu.memory_space<vmem>>, vector<4x16x4xf32>,
    }
    %c7_i32_17 = arith.constant 7 : i32
    %c0_i32_18 = arith.constant 0 : i32
    %c4_i32 = arith.constant 4 : i32
    %12 = arith.addi %c0_i32_18, %c4_i32 : i32
    %c1_i32_19 = arith.constant 1 : i32
    scf.for %arg8 = %c0_i32_18 to %12 step %c1_i32_19  : i32 {
      %c4_i32_21 = arith.constant 4 : i32
      %13 = arith.muli %arg8, %c4_i32_21 : i32
      %c12_i32 = arith.constant 12 : i32
      %14 = arith.minsi %13, %c12_i32 : i32
      %c0_i32_22 = arith.constant 0 : i32
      %15 = arith.addi %14, %c0_i32_22 : i32
      %16 = arith.index_cast %15 : i32 to index
      %c0_23 = arith.constant 0 : index
      %c0_24 = arith.constant 0 : index
      %17 = vector.load %arg7[%16, %c0_23, %c0_24] : memref<28x16x4xf32, #tpu.memory_space<vmem>>, vector<4x16x4xf32>
      %c0_i32_25 = arith.constant 0 : i32
      %18 = arith.addi %14, %c0_i32_25 : i32
      %c1_i32_26 = arith.constant 1 : i32
      %19 = arith.addi %18, %c1_i32_26 : i32
      %20 = arith.index_cast %19 : i32 to index
      %c0_27 = arith.constant 0 : index
      %c0_28 = arith.constant 0 : index
      %21 = vector.load %arg7[%20, %c0_27, %c0_28] : memref<28x16x4xf32, #tpu.memory_space<vmem>>, vector<4x16x4xf32>
      %22 = arith.maximumf %17, %21 : vector<4x16x4xf32>
      %c0_i32_29 = arith.constant 0 : i32
      %23 = arith.addi %14, %c0_i32_29 : i32
      %c2_i32 = arith.constant 2 : i32
      %24 = arith.addi %23, %c2_i32 : i32
      %25 = arith.index_cast %24 : i32 to index
      %c0_30 = arith.constant 0 : index
      %c0_31 = arith.constant 0 : index
      %26 = vector.load %arg7[%25, %c0_30, %c0_31] : memref<28x16x4xf32, #tpu.memory_space<vmem>>, vector<4x16x4xf32>
      %27 = arith.maximumf %22, %26 : vector<4x16x4xf32>
      %c0_i32_32 = arith.constant 0 : i32
      %28 = arith.addi %14, %c0_i32_32 : i32
      %c3_i32 = arith.constant 3 : i32
      %29 = arith.addi %28, %c3_i32 : i32
      %30 = arith.index_cast %29 : i32 to index
      %c0_33 = arith.constant 0 : index
      %c0_34 = arith.constant 0 : index
      %31 = vector.load %arg7[%30, %c0_33, %c0_34] : memref<28x16x4xf32, #tpu.memory_space<vmem>>, vector<4x16x4xf32>
      %32 = arith.maximumf %27, %31 : vector<4x16x4xf32>
      %c0_i32_35 = arith.constant 0 : i32
      %33 = arith.addi %14, %c0_i32_35 : i32
      %c4_i32_36 = arith.constant 4 : i32
      %34 = arith.addi %33, %c4_i32_36 : i32
      %35 = arith.index_cast %34 : i32 to index
      %c0_37 = arith.constant 0 : index
      %c0_38 = arith.constant 0 : index
      %36 = vector.load %arg7[%35, %c0_37, %c0_38] : memref<28x16x4xf32, #tpu.memory_space<vmem>>, vector<4x16x4xf32>
      %37 = arith.maximumf %32, %36 : vector<4x16x4xf32>
      %c0_i32_39 = arith.constant 0 : i32
      %38 = arith.addi %14, %c0_i32_39 : i32
      %c5_i32 = arith.constant 5 : i32
      %39 = arith.addi %38, %c5_i32 : i32
      %40 = arith.index_cast %39 : i32 to index
      %c0_40 = arith.constant 0 : index
      %c0_41 = arith.constant 0 : index
      %41 = vector.load %arg7[%40, %c0_40, %c0_41] : memref<28x16x4xf32, #tpu.memory_space<vmem>>, vector<4x16x4xf32>
      %42 = arith.maximumf %37, %41 : vector<4x16x4xf32>
      %c0_i32_42 = arith.constant 0 : i32
      %43 = arith.addi %14, %c0_i32_42 : i32
      %c6_i32 = arith.constant 6 : i32
      %44 = arith.addi %43, %c6_i32 : i32
      %45 = arith.index_cast %44 : i32 to index
      %c0_43 = arith.constant 0 : index
      %c0_44 = arith.constant 0 : index
      %46 = vector.load %arg7[%45, %c0_43, %c0_44] : memref<28x16x4xf32, #tpu.memory_space<vmem>>, vector<4x16x4xf32>
      %47 = arith.maximumf %42, %46 : vector<4x16x4xf32>
      %c0_i32_45 = arith.constant 0 : i32
      %48 = arith.addi %14, %c0_i32_45 : i32
      %c7_i32_46 = arith.constant 7 : i32
      %49 = arith.addi %48, %c7_i32_46 : i32
      %50 = arith.index_cast %49 : i32 to index
      %c0_47 = arith.constant 0 : index
      %c0_48 = arith.constant 0 : index
      %51 = vector.load %arg7[%50, %c0_47, %c0_48] : memref<28x16x4xf32, #tpu.memory_space<vmem>>, vector<4x16x4xf32>
      %52 = arith.maximumf %47, %51 : vector<4x16x4xf32>
      %c0_i32_49 = arith.constant 0 : i32
      %53 = arith.addi %14, %c0_i32_49 : i32
      %c8_i32 = arith.constant 8 : i32
      %54 = arith.addi %53, %c8_i32 : i32
      %55 = arith.index_cast %54 : i32 to index
      %c0_50 = arith.constant 0 : index
      %c0_51 = arith.constant 0 : index
      %56 = vector.load %arg7[%55, %c0_50, %c0_51] : memref<28x16x4xf32, #tpu.memory_space<vmem>>, vector<4x16x4xf32>
      %57 = arith.maximumf %52, %56 : vector<4x16x4xf32>
      %c0_i32_52 = arith.constant 0 : i32
      %58 = arith.addi %14, %c0_i32_52 : i32
      %c9_i32 = arith.constant 9 : i32
      %59 = arith.addi %58, %c9_i32 : i32
      %60 = arith.index_cast %59 : i32 to index
      %c0_53 = arith.constant 0 : index
      %c0_54 = arith.constant 0 : index
      %61 = vector.load %arg7[%60, %c0_53, %c0_54] : memref<28x16x4xf32, #tpu.memory_space<vmem>>, vector<4x16x4xf32>
      %62 = arith.maximumf %57, %61 : vector<4x16x4xf32>
      %c0_i32_55 = arith.constant 0 : i32
      %63 = arith.addi %14, %c0_i32_55 : i32
      %c10_i32 = arith.constant 10 : i32
      %64 = arith.addi %63, %c10_i32 : i32
      %65 = arith.index_cast %64 : i32 to index
      %c0_56 = arith.constant 0 : index
      %c0_57 = arith.constant 0 : index
      %66 = vector.load %arg7[%65, %c0_56, %c0_57] : memref<28x16x4xf32, #tpu.memory_space<vmem>>, vector<4x16x4xf32>
      %67 = arith.maximumf %62, %66 : vector<4x16x4xf32>
      %c0_i32_58 = arith.constant 0 : i32
      %68 = arith.addi %14, %c0_i32_58 : i32
      %c11_i32 = arith.constant 11 : i32
      %69 = arith.addi %68, %c11_i32 : i32
      %70 = arith.index_cast %69 : i32 to index
      %c0_59 = arith.constant 0 : index
      %c0_60 = arith.constant 0 : index
      %71 = vector.load %arg7[%70, %c0_59, %c0_60] : memref<28x16x4xf32, #tpu.memory_space<vmem>>, vector<4x16x4xf32>
      %72 = arith.maximumf %67, %71 : vector<4x16x4xf32>
      %c0_i32_61 = arith.constant 0 : i32
      %73 = arith.addi %14, %c0_i32_61 : i32
      %c12_i32_62 = arith.constant 12 : i32
      %74 = arith.addi %73, %c12_i32_62 : i32
      %75 = arith.index_cast %74 : i32 to index
      %c0_63 = arith.constant 0 : index
      %c0_64 = arith.constant 0 : index
      %76 = vector.load %arg7[%75, %c0_63, %c0_64] : memref<28x16x4xf32, #tpu.memory_space<vmem>>, vector<4x16x4xf32>
      %77 = arith.maximumf %72, %76 : vector<4x16x4xf32>
      %c0_65 = arith.constant 0 : index
      %c0_66 = arith.constant 0 : index
      %78 = arith.index_cast %14 : i32 to index
      %c0_67 = arith.constant 0 : index
      %c0_68 = arith.constant 0 : index
      %79 = vector.load %arg3[%c0_65, %c0_66, %78, %c0_67, %c0_68] : memref<1x4x16x16x4xf32, #tpu.memory_space<vmem>>, vector<1x1x4x16x4xf32>
      %80 = vector.shape_cast %79 : vector<1x1x4x16x4xf32> to vector<4x16x4xf32>
      %81 = vector.shape_cast %77 : vector<4x16x4xf32> to vector<1x1x4x16x4xf32>
      tpu.vector_store %arg3[%c0_65, %c0_66, %78, %c0_67, %c0_68], %81 {strides = array<i32>} : memref<1x4x16x16x4xf32, #tpu.memory_space<vmem>>, vector<1x1x4x16x4xf32>,
      %c2_i32_69 = arith.constant 2 : i32
      %82 = arith.addi %14, %c2_i32_69 : i32
      %83 = arith.index_cast %82 : i32 to index
      %c0_70 = arith.constant 0 : index
      %c0_71 = arith.constant 0 : index
      %84 = vector.load %arg6[%83, %c0_70, %c0_71] : memref<28x16x4xf32, #tpu.memory_space<vmem>>, vector<4x16x4xf32>
      %c2_i32_72 = arith.constant 2 : i32
      %85 = arith.addi %14, %c2_i32_72 : i32
      %c1_i32_73 = arith.constant 1 : i32
      %86 = arith.addi %85, %c1_i32_73 : i32
      %87 = arith.index_cast %86 : i32 to index
      %c0_74 = arith.constant 0 : index
      %c0_75 = arith.constant 0 : index
      %88 = vector.load %arg6[%87, %c0_74, %c0_75] : memref<28x16x4xf32, #tpu.memory_space<vmem>>, vector<4x16x4xf32>
      %89 = arith.maximumf %84, %88 : vector<4x16x4xf32>
      %c2_i32_76 = arith.constant 2 : i32
      %90 = arith.addi %14, %c2_i32_76 : i32
      %c2_i32_77 = arith.constant 2 : i32
      %91 = arith.addi %90, %c2_i32_77 : i32
      %92 = arith.index_cast %91 : i32 to index
      %c0_78 = arith.constant 0 : index
      %c0_79 = arith.constant 0 : index
      %93 = vector.load %arg6[%92, %c0_78, %c0_79] : memref<28x16x4xf32, #tpu.memory_space<vmem>>, vector<4x16x4xf32>
      %94 = arith.maximumf %89, %93 : vector<4x16x4xf32>
      %c2_i32_80 = arith.constant 2 : i32
      %95 = arith.addi %14, %c2_i32_80 : i32
      %c3_i32_81 = arith.constant 3 : i32
      %96 = arith.addi %95, %c3_i32_81 : i32
      %97 = arith.index_cast %96 : i32 to index
      %c0_82 = arith.constant 0 : index
      %c0_83 = arith.constant 0 : index
      %98 = vector.load %arg6[%97, %c0_82, %c0_83] : memref<28x16x4xf32, #tpu.memory_space<vmem>>, vector<4x16x4xf32>
      %99 = arith.maximumf %94, %98 : vector<4x16x4xf32>
      %c2_i32_84 = arith.constant 2 : i32
      %100 = arith.addi %14, %c2_i32_84 : i32
      %c4_i32_85 = arith.constant 4 : i32
      %101 = arith.addi %100, %c4_i32_85 : i32
      %102 = arith.index_cast %101 : i32 to index
      %c0_86 = arith.constant 0 : index
      %c0_87 = arith.constant 0 : index
      %103 = vector.load %arg6[%102, %c0_86, %c0_87] : memref<28x16x4xf32, #tpu.memory_space<vmem>>, vector<4x16x4xf32>
      %104 = arith.maximumf %99, %103 : vector<4x16x4xf32>
      %c2_i32_88 = arith.constant 2 : i32
      %105 = arith.addi %14, %c2_i32_88 : i32
      %c5_i32_89 = arith.constant 5 : i32
      %106 = arith.addi %105, %c5_i32_89 : i32
      %107 = arith.index_cast %106 : i32 to index
      %c0_90 = arith.constant 0 : index
      %c0_91 = arith.constant 0 : index
      %108 = vector.load %arg6[%107, %c0_90, %c0_91] : memref<28x16x4xf32, #tpu.memory_space<vmem>>, vector<4x16x4xf32>
      %109 = arith.maximumf %104, %108 : vector<4x16x4xf32>
      %c2_i32_92 = arith.constant 2 : i32
      %110 = arith.addi %14, %c2_i32_92 : i32
      %c6_i32_93 = arith.constant 6 : i32
      %111 = arith.addi %110, %c6_i32_93 : i32
      %112 = arith.index_cast %111 : i32 to index
      %c0_94 = arith.constant 0 : index
      %c0_95 = arith.constant 0 : index
      %113 = vector.load %arg6[%112, %c0_94, %c0_95] : memref<28x16x4xf32, #tpu.memory_space<vmem>>, vector<4x16x4xf32>
      %114 = arith.maximumf %109, %113 : vector<4x16x4xf32>
      %c2_i32_96 = arith.constant 2 : i32
      %115 = arith.addi %14, %c2_i32_96 : i32
      %c7_i32_97 = arith.constant 7 : i32
      %116 = arith.addi %115, %c7_i32_97 : i32
      %117 = arith.index_cast %116 : i32 to index
      %c0_98 = arith.constant 0 : index
      %c0_99 = arith.constant 0 : index
      %118 = vector.load %arg6[%117, %c0_98, %c0_99] : memref<28x16x4xf32, #tpu.memory_space<vmem>>, vector<4x16x4xf32>
      %119 = arith.maximumf %114, %118 : vector<4x16x4xf32>
      %c2_i32_100 = arith.constant 2 : i32
      %120 = arith.addi %14, %c2_i32_100 : i32
      %c8_i32_101 = arith.constant 8 : i32
      %121 = arith.addi %120, %c8_i32_101 : i32
      %122 = arith.index_cast %121 : i32 to index
      %c0_102 = arith.constant 0 : index
      %c0_103 = arith.constant 0 : index
      %123 = vector.load %arg6[%122, %c0_102, %c0_103] : memref<28x16x4xf32, #tpu.memory_space<vmem>>, vector<4x16x4xf32>
      %124 = arith.maximumf %119, %123 : vector<4x16x4xf32>
      %c0_104 = arith.constant 0 : index
      %c1 = arith.constant 1 : index
      %125 = arith.index_cast %14 : i32 to index
      %c0_105 = arith.constant 0 : index
      %c0_106 = arith.constant 0 : index
      %126 = vector.load %arg3[%c0_104, %c1, %125, %c0_105, %c0_106] : memref<1x4x16x16x4xf32, #tpu.memory_space<vmem>>, vector<1x1x4x16x4xf32>
      %127 = vector.shape_cast %126 : vector<1x1x4x16x4xf32> to vector<4x16x4xf32>
      %128 = vector.shape_cast %124 : vector<4x16x4xf32> to vector<1x1x4x16x4xf32>
      tpu.vector_store %arg3[%c0_104, %c1, %125, %c0_105, %c0_106], %128 {strides = array<i32>} : memref<1x4x16x16x4xf32, #tpu.memory_space<vmem>>, vector<1x1x4x16x4xf32>,
      %c4_i32_107 = arith.constant 4 : i32
      %129 = arith.addi %14, %c4_i32_107 : i32
      %130 = arith.index_cast %129 : i32 to index
      %c0_108 = arith.constant 0 : index
      %c0_109 = arith.constant 0 : index
      %131 = vector.load %arg5[%130, %c0_108, %c0_109] : memref<28x16x4xf32, #tpu.memory_space<vmem>>, vector<4x16x4xf32>
      %c4_i32_110 = arith.constant 4 : i32
      %132 = arith.addi %14, %c4_i32_110 : i32
      %c1_i32_111 = arith.constant 1 : i32
      %133 = arith.addi %132, %c1_i32_111 : i32
      %134 = arith.index_cast %133 : i32 to index
      %c0_112 = arith.constant 0 : index
      %c0_113 = arith.constant 0 : index
      %135 = vector.load %arg5[%134, %c0_112, %c0_113] : memref<28x16x4xf32, #tpu.memory_space<vmem>>, vector<4x16x4xf32>
      %136 = arith.maximumf %131, %135 : vector<4x16x4xf32>
      %c4_i32_114 = arith.constant 4 : i32
      %137 = arith.addi %14, %c4_i32_114 : i32
      %c2_i32_115 = arith.constant 2 : i32
      %138 = arith.addi %137, %c2_i32_115 : i32
      %139 = arith.index_cast %138 : i32 to index
      %c0_116 = arith.constant 0 : index
      %c0_117 = arith.constant 0 : index
      %140 = vector.load %arg5[%139, %c0_116, %c0_117] : memref<28x16x4xf32, #tpu.memory_space<vmem>>, vector<4x16x4xf32>
      %141 = arith.maximumf %136, %140 : vector<4x16x4xf32>
      %c4_i32_118 = arith.constant 4 : i32
      %142 = arith.addi %14, %c4_i32_118 : i32
      %c3_i32_119 = arith.constant 3 : i32
      %143 = arith.addi %142, %c3_i32_119 : i32
      %144 = arith.index_cast %143 : i32 to index
      %c0_120 = arith.constant 0 : index
      %c0_121 = arith.constant 0 : index
      %145 = vector.load %arg5[%144, %c0_120, %c0_121] : memref<28x16x4xf32, #tpu.memory_space<vmem>>, vector<4x16x4xf32>
      %146 = arith.maximumf %141, %145 : vector<4x16x4xf32>
      %c4_i32_122 = arith.constant 4 : i32
      %147 = arith.addi %14, %c4_i32_122 : i32
      %c4_i32_123 = arith.constant 4 : i32
      %148 = arith.addi %147, %c4_i32_123 : i32
      %149 = arith.index_cast %148 : i32 to index
      %c0_124 = arith.constant 0 : index
      %c0_125 = arith.constant 0 : index
      %150 = vector.load %arg5[%149, %c0_124, %c0_125] : memref<28x16x4xf32, #tpu.memory_space<vmem>>, vector<4x16x4xf32>
      %151 = arith.maximumf %146, %150 : vector<4x16x4xf32>
      %c0_126 = arith.constant 0 : index
      %c2 = arith.constant 2 : index
      %152 = arith.index_cast %14 : i32 to index
      %c0_127 = arith.constant 0 : index
      %c0_128 = arith.constant 0 : index
      %153 = vector.load %arg3[%c0_126, %c2, %152, %c0_127, %c0_128] : memref<1x4x16x16x4xf32, #tpu.memory_space<vmem>>, vector<1x1x4x16x4xf32>
      %154 = vector.shape_cast %153 : vector<1x1x4x16x4xf32> to vector<4x16x4xf32>
      %155 = vector.shape_cast %151 : vector<4x16x4xf32> to vector<1x1x4x16x4xf32>
      tpu.vector_store %arg3[%c0_126, %c2, %152, %c0_127, %c0_128], %155 {strides = array<i32>} : memref<1x4x16x16x4xf32, #tpu.memory_space<vmem>>, vector<1x1x4x16x4xf32>,
      %c0_129 = arith.constant 0 : index
      %156 = arith.index_cast %14 : i32 to index
      %c0_130 = arith.constant 0 : index
      %c0_131 = arith.constant 0 : index
      %157 = vector.load %arg2[%c0_129, %156, %c0_130, %c0_131] : memref<1x16x16x4xf32, #tpu.memory_space<vmem>>, vector<1x4x16x4xf32>
      %158 = vector.shape_cast %157 : vector<1x4x16x4xf32> to vector<4x16x4xf32>
      %c0_132 = arith.constant 0 : index
      %c3 = arith.constant 3 : index
      %159 = arith.index_cast %14 : i32 to index
      %c0_133 = arith.constant 0 : index
      %c0_134 = arith.constant 0 : index
      %160 = vector.load %arg3[%c0_132, %c3, %159, %c0_133, %c0_134] : memref<1x4x16x16x4xf32, #tpu.memory_space<vmem>>, vector<1x1x4x16x4xf32>
      %161 = vector.shape_cast %160 : vector<1x1x4x16x4xf32> to vector<4x16x4xf32>
      %162 = vector.shape_cast %158 : vector<4x16x4xf32> to vector<1x1x4x16x4xf32>
      tpu.vector_store %arg3[%c0_132, %c3, %159, %c0_133, %c0_134], %162 {strides = array<i32>} : memref<1x4x16x16x4xf32, #tpu.memory_space<vmem>>, vector<1x1x4x16x4xf32>,
    }
    %c4_i32_20 = arith.constant 4 : i32
    return
  }
  func.func @transform_0(%arg0: i32, %arg1: i32) -> (i32, i32, i32, i32) {
    %c0_i32 = arith.constant 0 : i32
    %c0_i32_0 = arith.constant 0 : i32
    %c0_i32_1 = arith.constant 0 : i32
    return %arg0, %c0_i32, %c0_i32_0, %arg1 : i32, i32, i32, i32
  }
  func.func @transform_1(%arg0: i32, %arg1: i32) -> (i32, i32, i32, i32, i32) {
    %c0_i32 = arith.constant 0 : i32
    %c0_i32_0 = arith.constant 0 : i32
    %c0_i32_1 = arith.constant 0 : i32
    %c0_i32_2 = arith.constant 0 : i32
    return %arg0, %c0_i32, %c0_i32_0, %c0_i32_1, %arg1 : i32, i32, i32, i32, i32
  }
}

</mosaic_0001>

<bundles_post_ra>
// kernel: spatial_pyramid_pooling.1
= control target key start
LH: loop header
LB: loop body
LE: loop exit
PB: predicated region body
PF: predicated region fallthrough
CT: control target
= control target key end

     0   :  { %s1978_s6 = smov 0   ;;  %s1980_s7 = smov 0   ;;  %s2993_s0 = inlined_call_operand.vmem [shape: f32[2,16,16,4], index: 0, kind: input, shape index: {}]   ;;  %s2994_s1 = inlined_call_operand.vmem [shape: f32[2,4,16,16,4], index: 1, kind: output, shape index: {}]  }
   0x1   :  { %s1982_s8 = smov 0  }
   0x2 LB: > { %s23_s9 = sadd.s32 1, %s1953_s7  ;;  %p1609_p0 = scmp.ge.s32.totalorder %s1957_s8, 1  ;;  %s1957_s8 = sphi %s1982_s8, %s11_s8   ;;  %s1953_s7 = sphi %s1980_s7, %s2996_s7   ;;  %s1949_s6 = sphi %s1978_s6, %s2995_s6  }
   0x3   : > { %p25_p1 = scmp.ge.s32.totalorder %s23_s9, 2  ;;  %p106_p2 = scmp.lt.s32.totalorder %s1957_s8, 3 }
   0x5   : > { %s2998_s9 = smov (%p25_p1, %s23_s9), 0  ;;  %p107_p3 = pnand %p1609_p0, %p106_p2 }
   0x6   : > { %vm148_vm0 = vcmask (!%p107_p3), 31744   ;;  %vm152_vm1 = vcmask (!%p107_p3), 29696   ;;  %p132_p4 = scmp.lt.s32.totalorder (!%p107_p3), %s1949_s6, 1  ;;  %v1967_v0 = vmov (!%p107_p3), -inf   ;;  %s2236_s18 = smov (!%p107_p3), 0  }
   0x7   : > { %110 = sbr.rel (%p107_p3) target bundleno = 227 (0xe3), region = 24  ;;  %149 = vst.msk [vmem:[#allocation2] sm:$0xff] (!%p107_p3), %vm148_vm0, %v1967_v0  ;;  %150 = vst.msk [vmem:[#allocation2 + $0x8] sm:$0xff] (!%p107_p3), %vm148_vm0, %v1967_v0 }
   0x8   : > { %151 = vst.msk [vmem:[#allocation2 + $0x10] sm:$0xff] (!%p107_p3), %vm148_vm0, %v1967_v0  ;;  %154 = vst.msk [vmem:[#allocation2 + $0x20] sm:$0xff] (!%p107_p3), %vm148_vm0, %v1967_v0 }
   0x9   : > { %155 = vst.msk [vmem:[#allocation2 + $0x28] sm:$0xff] (!%p107_p3), %vm148_vm0, %v1967_v0  ;;  %156 = vst.msk [vmem:[#allocation2 + $0x30] sm:$0xff] (!%p107_p3), %vm148_vm0, %v1967_v0 }
   0xa   : > { %158 = vst.msk [vmem:[#allocation2 + $0x40] sm:$0xff] (!%p107_p3), %vm148_vm0, %v1967_v0  ;;  %159 = vst.msk [vmem:[#allocation2 + $0x48] sm:$0xff] (!%p107_p3), %vm148_vm0, %v1967_v0 }
   0xb   : > { %160 = vst.msk [vmem:[#allocation2 + $0x50] sm:$0xff] (!%p107_p3), %vm148_vm0, %v1967_v0  ;;  %162 = vst.msk [vmem:[#allocation2 + $0x60] sm:$0xff] (!%p107_p3), %vm148_vm0, %v1967_v0 }
   0xc   : > { %163 = vst.msk [vmem:[#allocation2 + $0x68] sm:$0xff] (!%p107_p3), %vm148_vm0, %v1967_v0  ;;  %164 = vst.msk [vmem:[#allocation2 + $0x70] sm:$0xff] (!%p107_p3), %vm148_vm0, %v1967_v0 }
   0xd   : > { %166 = vst.msk [vmem:[#allocation2 + $0x80] sm:$0xff] (!%p107_p3), %vm148_vm0, %v1967_v0  ;;  %167 = vst.msk [vmem:[#allocation2 + $0x88] sm:$0xff] (!%p107_p3), %vm148_vm0, %v1967_v0 }
   0xe   : > { %168 = vst.msk [vmem:[#allocation2 + $0x90] sm:$0xff] %vm148_vm0, %v1967_v0  ;;  %170 = vst.msk [vmem:[#allocation2 + $0xa0] sm:$0xff] %vm148_vm0, %v1967_v0  ;;  %s3000_s6 = smov (!%p132_p4, %s1949_s6), 1 }
   0xf   : > { %171 = vst.msk [vmem:[#allocation2 + $0xa8] sm:$0xff] %vm148_vm0, %v1967_v0  ;;  %172 = vst.msk [vmem:[#allocation2 + $0xb0] sm:$0xff] %vm148_vm0, %v1967_v0  ;;  %s1882_s10 = sshll.u32 %s3000_s6, 8  ;;  %s1883_s11 = sshll.u32 %s3000_s6, 10 }
  0x10   : > { %175 = vst.msk [vmem:[#allocation2 + $0x2c0] sm:$0xff] %vm148_vm0, %v1967_v0  ;;  %176 = vst.msk [vmem:[#allocation2 + $0x2c8] sm:$0xff] %vm148_vm0, %v1967_v0  ;;  %s2165_s14 = scalar_lea.vmem %s2993_s0, %s1882_s10  ;;  %s2170_s17 = scalar_lea.vmem %s2994_s1, %s1883_s11 }
  0x11   : > { %177 = vst.msk [vmem:[#allocation2 + $0x2d0] sm:$0xff] %vm148_vm0, %v1967_v0  ;;  %179 = vst.msk [vmem:[#allocation2 + $0x2e0] sm:$0xff] %vm148_vm0, %v1967_v0  ;;  %v232_v1 = vld [vmem:[%s2165_s14] sm:$0xff]  ;;  %v233_v2 = vld [vmem:[%s2165_s14 + $0x8] sm:$0xff] }
  0x12   : > { %180 = vst.msk [vmem:[#allocation2 + $0x2e8] sm:$0xff] %vm148_vm0, %v1967_v0  ;;  %181 = vst.msk [vmem:[#allocation2 + $0x2f0] sm:$0xff] %vm148_vm0, %v1967_v0  ;;  %v234_v3 = vld [vmem:[%s2165_s14 + $0x10] sm:$0xff]  ;;  %v235_v4 = vld [vmem:[%s2165_s14 + $0x18] sm:$0xff] }
  0x13   : > { %183 = vst.msk [vmem:[#allocation2 + $0x300] sm:$0xff] %vm148_vm0, %v1967_v0  ;;  %184 = vst.msk [vmem:[#allocation2 + $0x308] sm:$0xff] %vm148_vm0, %v1967_v0  ;;  %v236_v5 = vld [vmem:[%s2165_s14 + $0x20] sm:$0xff]  ;;  %v237_v6 = vld [vmem:[%s2165_s14 + $0x28] sm:$0xff] }
  0x14   : > { %185 = vst.msk [vmem:[#allocation2 + $0x310] sm:$0xff] %vm148_vm0, %v1967_v0  ;;  %187 = vst.msk [vmem:[#allocation2 + $0x320] sm:$0xff] %vm148_vm0, %v1967_v0  ;;  %v238_v7 = vld [vmem:[%s2165_s14 + $0x30] sm:$0xff]  ;;  %v239_v8 = vld [vmem:[%s2165_s14 + $0x38] sm:$0xff] }
  0x15   : > { %188 = vst.msk [vmem:[#allocation2 + $0x328] sm:$0xff] %vm148_vm0, %v1967_v0  ;;  %189 = vst.msk [vmem:[#allocation2 + $0x330] sm:$0xff] %vm148_vm0, %v1967_v0  ;;  %v240_v9 = vld [vmem:[%s2165_s14 + $0x40] sm:$0xff]  ;;  %v241_v10 = vld [vmem:[%s2165_s14 + $0x48] sm:$0xff] }
  0x16   : > { %191 = vst.msk [vmem:[#allocation2 + $0x340] sm:$0xff] %vm148_vm0, %v1967_v0  ;;  %192 = vst.msk [vmem:[#allocation2 + $0x348] sm:$0xff] %vm148_vm0, %v1967_v0  ;;  %v242_v11 = vld [vmem:[%s2165_s14 + $0x50] sm:$0xff]  ;;  %v243_v12 = vld [vmem:[%s2165_s14 + $0x58] sm:$0xff] }
  0x17   : > { %193 = vst.msk [vmem:[#allocation2 + $0x350] sm:$0xff] %vm148_vm0, %v1967_v0  ;;  %195 = vst.msk [vmem:[#allocation2 + $0x360] sm:$0xff] %vm148_vm0, %v1967_v0  ;;  %v244_v13 = vld [vmem:[%s2165_s14 + $0x60] sm:$0xff]  ;;  %v245_v14 = vld [vmem:[%s2165_s14 + $0x68] sm:$0xff] }
  0x18   : > { %196 = vst.msk [vmem:[#allocation2 + $0x368] sm:$0xff] %vm148_vm0, %v1967_v0  ;;  %197 = vst.msk [vmem:[#allocation2 + $0x370] sm:$0xff] %vm148_vm0, %v1967_v0  ;;  %v246_v15 = vld [vmem:[%s2165_s14 + $0x70] sm:$0xff]  ;;  %v247_v16 = vld [vmem:[%s2165_s14 + $0x78] sm:$0xff] }
  0x19   : > { %200 = vst.msk [vmem:[#allocation2 + $0xc0] sm:$0xff] %vm148_vm0, %v1967_v0  ;;  %201 = vst.msk [vmem:[#allocation2 + $0xe0] sm:$0xff] %vm148_vm0, %v1967_v0  ;;  %v248_v17 = vld [vmem:[%s2165_s14 + $0x80] sm:$0xff]  ;;  %v249_v18 = vld [vmem:[%s2165_s14 + $0x88] sm:$0xff] }
  0x1a   : > { %202 = vst.msk [vmem:[#allocation2 + $0x100] sm:$0xff] %vm148_vm0, %v1967_v0  ;;  %203 = vst.msk [vmem:[#allocation2 + $0x120] sm:$0xff] %vm148_vm0, %v1967_v0  ;;  %v250_v19 = vld [vmem:[%s2165_s14 + $0x90] sm:$0xff]  ;;  %v251_v20 = vld [vmem:[%s2165_s14 + $0x98] sm:$0xff] }
  0x1b   : > { %204 = vst.msk [vmem:[#allocation2 + $0x140] sm:$0xff] %vm148_vm0, %v1967_v0  ;;  %205 = vst.msk [vmem:[#allocation2 + $0x160] sm:$0xff] %vm148_vm0, %v1967_v0  ;;  %v252_v21 = vld [vmem:[%s2165_s14 + $0xa0] sm:$0xff]  ;;  %v253_v22 = vld [vmem:[%s2165_s14 + $0xa8] sm:$0xff] }
  0x1c   : > { %206 = vst.msk [vmem:[#allocation2 + $0x180] sm:$0xff] %vm148_vm0, %v1967_v0  ;;  %207 = vst.msk [vmem:[#allocation2 + $0x1a0] sm:$0xff] %vm148_vm0, %v1967_v0  ;;  %v254_v23 = vld [vmem:[%s2165_s14 + $0xb0] sm:$0xff]  ;;  %v255_v24 = vld [vmem:[%s2165_s14 + $0xb8] sm:$0xff] }
  0x1d   : > { %208 = vst.msk [vmem:[#allocation2 + $0x1c0] sm:$0xff] %vm148_vm0, %v1967_v0  ;;  %209 = vst.msk [vmem:[#allocation2 + $0x1e0] sm:$0xff] %vm148_vm0, %v1967_v0  ;;  %v256_v25 = vld [vmem:[%s2165_s14 + $0xc0] sm:$0xff]  ;;  %v257_v26 = vld [vmem:[%s2165_s14 + $0xc8] sm:$0xff] }
  0x1e   : > { %210 = vst.msk [vmem:[#allocation2 + $0x200] sm:$0xff] %vm148_vm0, %v1967_v0  ;;  %211 = vst.msk [vmem:[#allocation2 + $0x220] sm:$0xff] %vm148_vm0, %v1967_v0  ;;  %v258_v27 = vld [vmem:[%s2165_s14 + $0xd0] sm:$0xff]  ;;  %v259_v28 = vld [vmem:[%s2165_s14 + $0xd8] sm:$0xff] }
  0x1f   : > { %212 = vst.msk [vmem:[#allocation2 + $0x240] sm:$0xff] %vm148_vm0, %v1967_v0  ;;  %213 = vst.msk [vmem:[#allocation2 + $0x260] sm:$0xff] %vm148_vm0, %v1967_v0  ;;  %v260_v29 = vld [vmem:[%s2165_s14 + $0xe0] sm:$0xff]  ;;  %v261_v30 = vld [vmem:[%s2165_s14 + $0xe8] sm:$0xff] }
  0x20   : > { %214 = vst.msk [vmem:[#allocation2 + $0x280] sm:$0xff] %vm148_vm0, %v1967_v0  ;;  %215 = vst.msk [vmem:[#allocation2 + $0x2a0] sm:$0xff] %vm148_vm0, %v1967_v0  ;;  %v262_v31 = vld [vmem:[%s2165_s14 + $0xf0] sm:$0xff]  ;;  %v263_v32 = vld [vmem:[%s2165_s14 + $0xf8] sm:$0xff] }
  0x21   : > { %153 = vst.msk [vmem:[#allocation2 + $0x18] sm:$0x3f] %vm152_vm1, %v1967_v0  ;;  %157 = vst.msk [vmem:[#allocation2 + $0x38] sm:$0x3f] %vm152_vm1, %v1967_v0 }
  0x22   : > { %161 = vst.msk [vmem:[#allocation2 + $0x58] sm:$0x3f] %vm152_vm1, %v1967_v0  ;;  %165 = vst.msk [vmem:[#allocation2 + $0x78] sm:$0x3f] %vm152_vm1, %v1967_v0 }
  0x23   : > { %169 = vst.msk [vmem:[#allocation2 + $0x98] sm:$0x3f] %vm152_vm1, %v1967_v0  ;;  %173 = vst.msk [vmem:[#allocation2 + $0xb8] sm:$0x3f] %vm152_vm1, %v1967_v0 }
  0x24   : > { %178 = vst.msk [vmem:[#allocation2 + $0x2d8] sm:$0x3f] %vm152_vm1, %v1967_v0  ;;  %182 = vst.msk [vmem:[#allocation2 + $0x2f8] sm:$0x3f] %vm152_vm1, %v1967_v0 }
  0x25   : > { %186 = vst.msk [vmem:[#allocation2 + $0x318] sm:$0x3f] %vm152_vm1, %v1967_v0  ;;  %190 = vst.msk [vmem:[#allocation2 + $0x338] sm:$0x3f] %vm152_vm1, %v1967_v0 }
  0x26   : > { %194 = vst.msk [vmem:[#allocation2 + $0x358] sm:$0x3f] %vm152_vm1, %v1967_v0  ;;  %198 = vst.msk [vmem:[#allocation2 + $0x378] sm:$0x3f] %vm152_vm1, %v1967_v0 }
  0x27   : > { %216 = vst.msk [vmem:[#allocation2 + $0xd8] sm:$0x3f] %vm152_vm1, %v1967_v0  ;;  %217 = vst.msk [vmem:[#allocation2 + $0xf8] sm:$0x3f] %vm152_vm1, %v1967_v0 }
  0x28   : > { %218 = vst.msk [vmem:[#allocation2 + $0x118] sm:$0x3f] %vm152_vm1, %v1967_v0  ;;  %219 = vst.msk [vmem:[#allocation2 + $0x138] sm:$0x3f] %vm152_vm1, %v1967_v0 }
  0x29   : > { %220 = vst.msk [vmem:[#allocation2 + $0x158] sm:$0x3f] %vm152_vm1, %v1967_v0  ;;  %221 = vst.msk [vmem:[#allocation2 + $0x178] sm:$0x3f] %vm152_vm1, %v1967_v0 }
  0x2a   : > { %222 = vst.msk [vmem:[#allocation2 + $0x198] sm:$0x3f] %vm152_vm1, %v1967_v0  ;;  %223 = vst.msk [vmem:[#allocation2 + $0x1b8] sm:$0x3f] %vm152_vm1, %v1967_v0 }
  0x2b   : > { %224 = vst.msk [vmem:[#allocation2 + $0x1d8] sm:$0x3f] %vm152_vm1, %v1967_v0  ;;  %225 = vst.msk [vmem:[#allocation2 + $0x1f8] sm:$0x3f] %vm152_vm1, %v1967_v0 }
  0x2c   : > { %226 = vst.msk [vmem:[#allocation2 + $0x218] sm:$0x3f] %vm152_vm1, %v1967_v0  ;;  %227 = vst.msk [vmem:[#allocation2 + $0x238] sm:$0x3f] %vm152_vm1, %v1967_v0 }
  0x2d   : > { %228 = vst.msk [vmem:[#allocation2 + $0x258] sm:$0x3f] %vm152_vm1, %v1967_v0  ;;  %229 = vst.msk [vmem:[#allocation2 + $0x278] sm:$0x3f] %vm152_vm1, %v1967_v0 }
  0x2e   : > { %230 = vst.msk [vmem:[#allocation2 + $0x298] sm:$0x3f] %vm152_vm1, %v1967_v0  ;;  %231 = vst.msk [vmem:[#allocation2 + $0x2b8] sm:$0x3f] %vm152_vm1, %v1967_v0 }
  0x2f   : > { %264 = vst.msk [vmem:[#allocation2 + $0xc8] sm:$0xff] %vm148_vm0, %v232_v1  ;;  %265 = vst.msk [vmem:[#allocation2 + $0xd0] sm:$0xff] %vm148_vm0, %v233_v2 }
  0x30   : > { %266 = vst.msk [vmem:[#allocation2 + $0xe8] sm:$0xff] %vm148_vm0, %v234_v3  ;;  %267 = vst.msk [vmem:[#allocation2 + $0xf0] sm:$0xff] %vm148_vm0, %v235_v4 }
  0x31   : > { %268 = vst.msk [vmem:[#allocation2 + $0x108] sm:$0xff] %vm148_vm0, %v236_v5  ;;  %269 = vst.msk [vmem:[#allocation2 + $0x110] sm:$0xff] %vm148_vm0, %v237_v6 }
  0x32   : > { %270 = vst.msk [vmem:[#allocation2 + $0x128] sm:$0xff] %vm148_vm0, %v238_v7  ;;  %271 = vst.msk [vmem:[#allocation2 + $0x130] sm:$0xff] %vm148_vm0, %v239_v8 }
  0x33   : > { %272 = vst.msk [vmem:[#allocation2 + $0x148] sm:$0xff] %vm148_vm0, %v240_v9  ;;  %273 = vst.msk [vmem:[#allocation2 + $0x150] sm:$0xff] %vm148_vm0, %v241_v10 }
  0x34   : > { %274 = vst.msk [vmem:[#allocation2 + $0x168] sm:$0xff] %vm148_vm0, %v242_v11  ;;  %275 = vst.msk [vmem:[#allocation2 + $0x170] sm:$0xff] %vm148_vm0, %v243_v12 }
  0x35   : > { %276 = vst.msk [vmem:[#allocation2 + $0x188] sm:$0xff] %vm148_vm0, %v244_v13  ;;  %277 = vst.msk [vmem:[#allocation2 + $0x190] sm:$0xff] %vm148_vm0, %v245_v14 }
  0x36   : > { %278 = vst.msk [vmem:[#allocation2 + $0x1a8] sm:$0xff] %vm148_vm0, %v246_v15  ;;  %279 = vst.msk [vmem:[#allocation2 + $0x1b0] sm:$0xff] %vm148_vm0, %v247_v16 }
  0x37   : > { %280 = vst.msk [vmem:[#allocation2 + $0x1c8] sm:$0xff] %vm148_vm0, %v248_v17  ;;  %281 = vst.msk [vmem:[#allocation2 + $0x1d0] sm:$0xff] %vm148_vm0, %v249_v18 }
  0x38   : > { %282 = vst.msk [vmem:[#allocation2 + $0x1e8] sm:$0xff] %vm148_vm0, %v250_v19  ;;  %283 = vst.msk [vmem:[#allocation2 + $0x1f0] sm:$0xff] %vm148_vm0, %v251_v20 }
  0x39   : > { %284 = vst.msk [vmem:[#allocation2 + $0x208] sm:$0xff] %vm148_vm0, %v252_v21  ;;  %285 = vst.msk [vmem:[#allocation2 + $0x210] sm:$0xff] %vm148_vm0, %v253_v22 }
  0x3a   : > { %286 = vst.msk [vmem:[#allocation2 + $0x228] sm:$0xff] %vm148_vm0, %v254_v23  ;;  %287 = vst.msk [vmem:[#allocation2 + $0x230] sm:$0xff] %vm148_vm0, %v255_v24 }
  0x3b   : > { %288 = vst.msk [vmem:[#allocation2 + $0x248] sm:$0xff] %vm148_vm0, %v256_v25  ;;  %289 = vst.msk [vmem:[#allocation2 + $0x250] sm:$0xff] %vm148_vm0, %v257_v26 }
  0x3c   : > { %290 = vst.msk [vmem:[#allocation2 + $0x268] sm:$0xff] %vm148_vm0, %v258_v27  ;;  %291 = vst.msk [vmem:[#allocation2 + $0x270] sm:$0xff] %vm148_vm0, %v259_v28 }
  0x3d   : > { %292 = vst.msk [vmem:[#allocation2 + $0x288] sm:$0xff] %vm148_vm0, %v260_v29  ;;  %293 = vst.msk [vmem:[#allocation2 + $0x290] sm:$0xff] %vm148_vm0, %v261_v30 }
  0x3e   : > { %294 = vst.msk [vmem:[#allocation2 + $0x2a8] sm:$0xff] %vm148_vm0, %v262_v31  ;;  %295 = vst.msk [vmem:[#allocation2 + $0x2b0] sm:$0xff] %vm148_vm0, %v263_v32 }
  0x3f LB: >> { %s1884_s19 = sshll.u32 %s1961_s18, 7  ;;  %s2253_s21 = sshll.u32 %s1961_s18, 6  ;;  %vm451_vm2 = vcmask 31750   ;;  %vm476_vm3 = vcmask 1046528   ;;  %vm521_vm4 = vcmask 1045504   ;;  %vm570_vm5 = vcmask 1044480   ;;  %s1961_s18 = sphi %s2236_s18, %s301_s18  }
  0x40   : >> { %s2242_s20 = scalar_lea.vmem [#allocation2], %s1884_s19  ;;  %vm623_vm6 = vcmask 1043456   ;;  %s2275_s22 = scalar_lea.vmem [#allocation3], %s2253_s21  ;;  %vm677_vm7 = vcmask 31748   ;;  %vm680_vm8 = vcmask 27648   ;;  %vm880_vm9 = vcmask 31746  }
  0x41   : >> { %s2392_s23 = scalar_lea.vmem [#allocation4], %s2253_s21  ;;  %vm883_vm10 = vcmask 25600   ;;  %s2594_s24 = scalar_lea.vmem [#allocation5], %s2253_s21 }
  0x42   : >> { %s301_s18 = sadd.s32 1, %s1961_s18  }
  0x43   : >> { %p298_p5 = scmp.ge.s32.totalorder %s301_s18, 7  }
  0x44   : > { %s2695_s25 = smov (%p298_p5), 0  }
  0x45   : >> { %v305_v33 = vld [vmem:[%s2242_s20] sm:$0xff]  ;;  %v306_v37 = vld [vmem:[%s2242_s20 + $0x8] sm:$0xff]  ;;  %v307_v44 = vld [vmem:[%s2242_s20 + $0x10] sm:$0xff] }
  0x46   : >> { %v321_v34 = vld [vmem:[%s2242_s20 + $0x1] sm:$0xff]  ;;  %v322_v39 = vld [vmem:[%s2242_s20 + $0x9] sm:$0xff]  ;;  %v323_v45 = vld [vmem:[%s2242_s20 + $0x11] sm:$0xff] }
  0x47   : >> { %v353_v35 = vld [vmem:[%s2242_s20 + $0x2] sm:$0xff]  ;;  %v337_v36 = vmax.f32 %v305_v33, %v321_v34  ;;  %v354_v40 = vld [vmem:[%s2242_s20 + $0xa] sm:$0xff]  ;;  %v338_v43 = vmax.f32 %v306_v37, %v322_v39  ;;  %v339_v47 = vmax.f32 %v307_v44, %v323_v45  ;;  %v355_v48 = vld [vmem:[%s2242_s20 + $0x12] sm:$0xff] }
  0x48   : >> { %v385_v38 = vld [vmem:[%s2242_s20 + $0x3] sm:$0xff]  ;;  %v386_v46 = vld [vmem:[%s2242_s20 + $0xb] sm:$0xff]  ;;  %v387_v49 = vld [vmem:[%s2242_s20 + $0x13] sm:$0xff] }
  0x49   : >> { %v369_v41 = vmax.f32 %v337_v36, %v353_v35  ;;  %v417_v42 = vld [vmem:[%s2242_s20 + $0x4] sm:$0xff]  ;;  %v370_v51 = vmax.f32 %v338_v43, %v354_v40  ;;  %v418_v55 = vld [vmem:[%s2242_s20 + $0xc] sm:$0xff]  ;;  %v371_v56 = vmax.f32 %v339_v47, %v355_v48  ;;  %v419_v57 = vld [vmem:[%s2242_s20 + $0x14] sm:$0xff] }
  0x4a   : >> { %v309_v52 = vld [vmem:[%s2242_s20 + $0x20] sm:$0xff]  ;;  %v310_v59 = vld [vmem:[%s2242_s20 + $0x28] sm:$0xff]  ;;  %v311_v5 = vld [vmem:[%s2242_s20 + $0x30] sm:$0xff] }
  0x4b   : >> { %v401_v50 = vmax.f32 %v369_v41, %v385_v38  ;;  %v325_v53 = vld [vmem:[%s2242_s20 + $0x21] sm:$0xff]  ;;  %v402_v61 = vmax.f32 %v370_v51, %v386_v46  ;;  %v326_v63 = vld [vmem:[%s2242_s20 + $0x29] sm:$0xff]  ;;  %v403_v1 = vmax.f32 %v371_v56, %v387_v49  ;;  %v327_v6 = vld [vmem:[%s2242_s20 + $0x31] sm:$0xff] }
  0x4c   : >> { %v357_v54 = vld [vmem:[%s2242_s20 + $0x22] sm:$0xff]  ;;  %v341_v58 = vmax.f32 %v309_v52, %v325_v53  ;;  %v358_v0 = vld [vmem:[%s2242_s20 + $0x2a] sm:$0xff]  ;;  %v342_v4 = vmax.f32 %v310_v59, %v326_v63  ;;  %v343_v9 = vmax.f32 %v311_v5, %v327_v6  ;;  %v359_v10 = vld [vmem:[%s2242_s20 + $0x32] sm:$0xff] }
  0x4d   : >> { %v2266_v60 = vmax.f32 %v401_v50, %v417_v42  ;;  %v389_v62 = vld [vmem:[%s2242_s20 + $0x23] sm:$0xff]  ;;  %v2280_v7 = vmax.f32 %v402_v61, %v418_v55  ;;  %v390_v8 = vld [vmem:[%s2242_s20 + $0x2b] sm:$0xff]  ;;  %v391_v11 = vld [vmem:[%s2242_s20 + $0x33] sm:$0xff]  ;;  %v2287_v14 = vmax.f32 %v403_v1, %v419_v57 }
  0x4e   : >> { %v373_v2 = vmax.f32 %v341_v58, %v357_v54  ;;  %v421_v3 = vld [vmem:[%s2242_s20 + $0x24] sm:$0xff]  ;;  %v374_v16 = vmax.f32 %v342_v4, %v358_v0  ;;  %v422_v21 = vld [vmem:[%s2242_s20 + $0x2c] sm:$0xff]  ;;  %v375_v22 = vmax.f32 %v343_v9, %v359_v10  ;;  %v423_v23 = vld [vmem:[%s2242_s20 + $0x34] sm:$0xff] }
  0x4f   : >> { %452 = vst.msk [vmem:[%s2275_s22 - $0x6] sm:$0xc0] %vm451_vm2, %v2266_v60  ;;  %v477_v12 = vrot.slane %v2266_v60, 1  ;;  %v522_v13 = vrot.slane %v2266_v60, 2  ;;  %v313_v17 = vld [vmem:[%s2242_s20 + $0x40] sm:$0xff]  ;;  %v571_v20 = vrot.slane %v2266_v60, 3 }
  0x50   : >> { %v405_v15 = vmax.f32 %v373_v2, %v389_v62  ;;  %v329_v18 = vld [vmem:[%s2242_s20 + $0x41] sm:$0xff]  ;;  %453 = vst.msk [vmem:[%s2275_s22 + $0x2] sm:$0xff] %vm148_vm0, %v2280_v7  ;;  %v478_v26 = vrot.slane %v2280_v7, 1  ;;  %v523_v27 = vrot.slane %v2280_v7, 2  ;;  %v406_v29 = vmax.f32 %v374_v16, %v390_v8  ;;  %v330_v31 = vld [vmem:[%s2242_s20 + $0x49] sm:$0xff]  ;;  %v331_v40 = vld [vmem:[%s2242_s20 + $0x51] sm:$0xff] }
  0x51   : >> { %v361_v19 = vld [vmem:[%s2242_s20 + $0x42] sm:$0xff]  ;;  %v345_v24 = vmax.f32 %v313_v17, %v329_v18  ;;  %454 = vst.msk [vmem:[%s2275_s22 + $0xa] sm:$0x3f] %vm152_vm1, %v2287_v14  ;;  %v362_v32 = vld [vmem:[%s2242_s20 + $0x4a] sm:$0xff]  ;;  %v572_v33 = vrot.slane %v2280_v7, 3  ;;  %v624_v34 = vrot.slane %v2266_v60, 4  ;;  %v407_v35 = vmax.f32 %v375_v22, %v391_v11 }
  0x52   : >> { %v314_v25 = vld [vmem:[%s2242_s20 + $0x48] sm:$0xff]  ;;  %v2304_v28 = vmax.f32 %v405_v15, %v421_v3  ;;  %v315_v39 = vld [vmem:[%s2242_s20 + $0x50] sm:$0xff]  ;;  %v479_v41 = vsel %vm476_vm3, %v477_v12, %v478_v26  ;;  %v2320_v42 = vmax.f32 %v406_v29, %v422_v21  ;;  %v524_v48 = vsel %vm521_vm4, %v522_v13, %v523_v27  ;;  %v317_v52 = vld [vmem:[%s2242_s20 + $0x60] sm:$0xff] }
  0x53   : >> { %v393_v30 = vld [vmem:[%s2242_s20 + $0x43] sm:$0xff]  ;;  %v377_v36 = vmax.f32 %v345_v24, %v361_v19  ;;  %v346_v38 = vmax.f32 %v314_v25, %v330_v31  ;;  %v394_v43 = vld [vmem:[%s2242_s20 + $0x4b] sm:$0xff]  ;;  %v347_v44 = vmax.f32 %v315_v39, %v331_v40  ;;  %v395_v46 = vld [vmem:[%s2242_s20 + $0x53] sm:$0xff]  ;;  %v509_v47 = vmax.f32 %v2266_v60, %v479_v41 }
  0x54   : >> { %v425_v37 = vld [vmem:[%s2242_s20 + $0x44] sm:$0xff]  ;;  %455 = vst.msk [vmem:[%s2275_s22 + $0xa] sm:$0xc0] %vm451_vm2, %v2304_v28  ;;  %v363_v45 = vld [vmem:[%s2242_s20 + $0x52] sm:$0xff]  ;;  %v2329_v49 = vmax.f32 %v407_v35, %v423_v23  ;;  %v573_v55 = vsel %vm570_vm5, %v571_v20, %v572_v33  ;;  %v625_v62 = vrot.slane %v2280_v7, 4  ;;  %v480_v4 = vrot.slane %v2287_v14, 1 }
  0x55   : >> { %v409_v50 = vmax.f32 %v377_v36, %v393_v30  ;;  %v378_v51 = vmax.f32 %v346_v38, %v362_v32  ;;  %v333_v53 = vld [vmem:[%s2242_s20 + $0x61] sm:$0xff]  ;;  %456 = vst.msk [vmem:[%s2275_s22 + $0x12] sm:$0xff] %vm148_vm0, %v2320_v42  ;;  %v426_v56 = vld [vmem:[%s2242_s20 + $0x4c] sm:$0xff]  ;;  %v379_v57 = vmax.f32 %v347_v44, %v363_v45  ;;  %v427_v58 = vld [vmem:[%s2242_s20 + $0x54] sm:$0xff]  ;;  %v554_v61 = vmax.f32 %v509_v47, %v524_v48 }
  0x56   : >> { %v365_v54 = vld [vmem:[%s2242_s20 + $0x62] sm:$0xff]  ;;  %v349_v59 = vmax.f32 %v317_v52, %v333_v53  ;;  %457 = vst.msk [vmem:[%s2275_s22 + $0x1a] sm:$0x3f] %vm152_vm1, %v2329_v49  ;;  %v366_v3 = vld [vmem:[%s2242_s20 + $0x6a] sm:$0xff]  ;;  %v525_v5 = vrot.slane %v2287_v14, 2  ;;  %v367_v18 = vld [vmem:[%s2242_s20 + $0x72] sm:$0xff]  ;;  %v626_v19 = vsel %vm623_vm6, %v624_v34, %v625_v62  ;;  %v481_v20 = vsel %vm476_vm3, %v478_v26, %v480_v4 }
  0x57   : >> { %v318_v60 = vld [vmem:[%s2242_s20 + $0x68] sm:$0xff]  ;;  %v2347_v63 = vmax.f32 %v409_v50, %v425_v37  ;;  %v410_v0 = vmax.f32 %v378_v51, %v394_v43  ;;  %v411_v6 = vmax.f32 %v379_v57, %v395_v46  ;;  %v319_v10 = vld [vmem:[%s2242_s20 + $0x70] sm:$0xff]  ;;  %v611_v12 = vmax.f32 %v554_v61, %v573_v55  ;;  %v308_v29 = vld [vmem:[%s2242_s20 + $0x18] sm:$0x3] }
  0x58   : >> { %v397_v1 = vld [vmem:[%s2242_s20 + $0x63] sm:$0xff]  ;;  %v381_v8 = vmax.f32 %v349_v59, %v365_v54  ;;  %v335_v11 = vld [vmem:[%s2242_s20 + $0x71] sm:$0xff]  ;;  %v324_v30 = vld [vmem:[%s2242_s20 + $0x19] sm:$0x3]  ;;  %v510_v34 = vmax.f32 %v2280_v7, %v481_v20  ;;  %v526_v26 = vsel %vm521_vm4, %v523_v27, %v525_v5  ;;  %v574_v35 = vrot.slane %v2287_v14, 3 }
  0x59   : >> { %v334_v2 = vld [vmem:[%s2242_s20 + $0x69] sm:$0xff]  ;;  %458 = vst.msk [vmem:[%s2275_s22 + $0x1a] sm:$0xc0] %vm451_vm2, %v2347_v63  ;;  %v2359_v13 = vmax.f32 %v410_v0, %v426_v56  ;;  %v351_v17 = vmax.f32 %v319_v10, %v335_v11  ;;  %v2368_v21 = vmax.f32 %v411_v6, %v427_v58  ;;  %v399_v24 = vld [vmem:[%s2242_s20 + $0x73] sm:$0xff]  ;;  %v2371_v25 = vmax.f32 %v611_v12, %v626_v19  ;;  %v388_v45 = vld [vmem:[%s2242_s20 + $0x1b] sm:$0x3] }
  0x5a   : >> { %v350_v9 = vmax.f32 %v318_v60, %v334_v2  ;;  %v429_v15 = vld [vmem:[%s2242_s20 + $0x64] sm:$0xff]  ;;  %v413_v22 = vmax.f32 %v381_v8, %v397_v1  ;;  %v430_v31 = vld [vmem:[%s2242_s20 + $0x6c] sm:$0xff]  ;;  %v356_v36 = vld [vmem:[%s2242_s20 + $0x1a] sm:$0x3]  ;;  %v627_v27 = vrot.slane %v2287_v14, 4  ;;  %v340_v40 = vmax.f32 %v308_v29, %v324_v30 }
  0x5b   : >> { %v398_v16 = vld [vmem:[%s2242_s20 + $0x6b] sm:$0xff]  ;;  %459 = vst.msk [vmem:[%s2275_s22 + $0x22] sm:$0xff] %vm148_vm0, %v2359_v13  ;;  %v383_v32 = vmax.f32 %v351_v17, %v367_v18  ;;  %v431_v39 = vld [vmem:[%s2242_s20 + $0x74] sm:$0xff]  ;;  %v555_v43 = vmax.f32 %v510_v34, %v526_v26  ;;  %v575_v44 = vsel %vm570_vm5, %v572_v33, %v574_v35  ;;  %v511_v46 = vmax.f32 %v2287_v14, %v480_v4  ;;  %v420_v7 = vld [vmem:[%s2242_s20 + $0x1c] sm:$0x3] }
  0x5c   : >> { %v382_v23 = vmax.f32 %v350_v9, %v366_v3  ;;  %460 = vst.msk [vmem:[%s2275_s22 + $0x2a] sm:$0x3f] %vm152_vm1, %v2368_v21  ;;  %v2388_v37 = vmax.f32 %v413_v22, %v429_v15  ;;  %v628_v48 = vsel %vm623_vm6, %v625_v62, %v627_v27  ;;  %v372_v50 = vmax.f32 %v340_v40, %v356_v36  ;;  %v312_v11 = vld [vmem:[%s2242_s20 + $0x38] sm:$0x3]  ;;  %v392_v36 = vld [vmem:[%s2242_s20 + $0x3b] sm:$0x3] }
  0x5d   : >> { %678 = vst.msk [vmem:[%s2392_s23 - $0x4] sm:$0xf0] %vm677_vm7, %v2371_v25  ;;  %v415_v41 = vmax.f32 %v383_v32, %v399_v24  ;;  %v482_v51 = vrot.slane %v2304_v28, 1  ;;  %v612_v53 = vmax.f32 %v555_v43, %v575_v44  ;;  %v556_v54 = vmax.f32 %v511_v46, %v525_v5  ;;  %v328_v12 = vld [vmem:[%s2242_s20 + $0x39] sm:$0x3] }
  0x5e   : >> { %v414_v38 = vmax.f32 %v382_v23, %v398_v16  ;;  %461 = vst.msk [vmem:[%s2275_s22 + $0x2a] sm:$0xc0] %vm451_vm2, %v2388_v37  ;;  %v483_v33 = vrot.slane %v2320_v42, 1  ;;  %v404_v14 = vmax.f32 %v372_v50, %v388_v45  ;;  %v527_v55 = vrot.slane %v2304_v28, 2  ;;  %v360_v24 = vld [vmem:[%s2242_s20 + $0x3a] sm:$0x3] }
  0x5f   : >> { %v2410_v52 = vmax.f32 %v415_v41, %v431_v39  ;;  %v528_v56 = vrot.slane %v2320_v42, 2  ;;  %v578_v57 = vrot.slane %v2304_v28, 3  ;;  %v2423_v58 = vmax.f32 %v612_v53, %v628_v48  ;;  %v424_v43 = vld [vmem:[%s2242_s20 + $0x3c] sm:$0x3] }
  0x60   : >> { %v2406_v47 = vmax.f32 %v414_v38, %v430_v31  ;;  %v484_v59 = vsel %vm476_vm3, %v482_v51, %v483_v33  ;;  %v579_v60 = vrot.slane %v2320_v42, 3  ;;  %v631_v61 = vrot.slane %v2304_v28, 4 }
  0x61   : >> { %463 = vst.msk [vmem:[%s2275_s22 + $0x3a] sm:$0x3f] %vm152_vm1, %v2410_v52  ;;  %v436_v62 = vmax.f32 %v404_v14, %v420_v7  ;;  %v512_v0 = vmax.f32 %v2304_v28, %v484_v59  ;;  %v529_v1 = vsel %vm521_vm4, %v527_v55, %v528_v56  ;;  %v632_v2 = vrot.slane %v2320_v42, 4 }
  0x62   : >> { %462 = vst.msk [vmem:[%s2275_s22 + $0x32] sm:$0xff] %vm148_vm0, %v2406_v47  ;;  %679 = vst.msk [vmem:[%s2392_s23 + $0x4] sm:$0xff] %vm148_vm0, %v2423_v58  ;;  %v580_v3 = vsel %vm570_vm5, %v578_v57, %v579_v60  ;;  %v485_v4 = vrot.slane %v2329_v49, 1  ;;  %v530_v5 = vrot.slane %v2329_v49, 2  ;;  %v581_v6 = vrot.slane %v2329_v49, 3 }
  0x63   : >> { %v576_v8 = vrot.slane %v436_v62, 3  ;;  %v629_v9 = vrot.slane %v436_v62, 4  ;;  %v557_v10 = vmax.f32 %v512_v0, %v529_v1  ;;  %v633_v28 = vsel %vm623_vm6, %v631_v61, %v632_v2  ;;  %v332_v61 = vld [vmem:[%s2242_s20 + $0x59] sm:$0x3] }
  0x64   : >> { %v486_v15 = vsel %vm476_vm3, %v483_v33, %v485_v4  ;;  %v531_v16 = vsel %vm521_vm4, %v528_v56, %v530_v5  ;;  %v582_v17 = vsel %vm570_vm5, %v579_v60, %v581_v6  ;;  %v634_v18 = vrot.slane %v2329_v49, 4  ;;  %v316_v60 = vld [vmem:[%s2242_s20 + $0x58] sm:$0x3] }
  0x65   : >> { %v577_v19 = vsel %vm570_vm5, %v574_v35, %v576_v8  ;;  %v630_v20 = vsel %vm623_vm6, %v627_v27, %v629_v9  ;;  %v614_v22 = vmax.f32 %v557_v10, %v580_v3  ;;  %v513_v23 = vmax.f32 %v2320_v42, %v486_v15  ;;  %v364_v8 = vld [vmem:[%s2242_s20 + $0x5a] sm:$0x3] }
  0x66   : >> { %v613_v29 = vmax.f32 %v556_v54, %v577_v19  ;;  %v635_v30 = vsel %vm623_vm6, %v632_v2, %v634_v18  ;;  %v344_v31 = vmax.f32 %v312_v11, %v328_v12  ;;  %v514_v32 = vmax.f32 %v2329_v49, %v485_v4  ;;  %v396_v19 = vld [vmem:[%s2242_s20 + $0x5b] sm:$0x3] }
  0x67   : >> { %v2453_v34 = vmax.f32 %v614_v22, %v633_v28  ;;  %v558_v26 = vmax.f32 %v513_v23, %v531_v16  ;;  %v487_v35 = vrot.slane %v2347_v63, 1  ;;  %v488_v38 = vrot.slane %v2359_v13, 1  ;;  %v428_v49 = vld [vmem:[%s2242_s20 + $0x5c] sm:$0x3] }
  0x68   : >> { %v2458_v39 = vmax.f32 %v613_v29, %v630_v20  ;;  %v376_v42 = vmax.f32 %v344_v31, %v360_v24  ;;  %v559_v27 = vmax.f32 %v514_v32, %v530_v5  ;;  %v532_v40 = vrot.slane %v2347_v63, 2 }
  0x69   : >> { %682 = vst.msk [vmem:[%s2392_s23 + $0xc] sm:$0xf0] %vm677_vm7, %v2453_v34  ;;  %v615_v41 = vmax.f32 %v558_v26, %v582_v17  ;;  %v489_v44 = vsel %vm476_vm3, %v487_v35, %v488_v38  ;;  %v533_v45 = vrot.slane %v2359_v13, 2  ;;  %v585_v46 = vrot.slane %v2347_v63, 3 }
  0x6a   : >> { %681 = vst.msk [vmem:[%s2392_s23 + $0xc] sm:$0xf] %vm680_vm8, %v2458_v39  ;;  %v408_v48 = vmax.f32 %v376_v42, %v392_v36  ;;  %v515_v50 = vmax.f32 %v2347_v63, %v489_v44  ;;  %v586_v51 = vrot.slane %v2359_v13, 3  ;;  %v638_v53 = vrot.slane %v2347_v63, 4 }
  0x6b   : >> { %v2474_v7 = vmax.f32 %v615_v41, %v635_v30  ;;  %v534_v54 = vsel %vm521_vm4, %v532_v40, %v533_v45  ;;  %v639_v33 = vrot.slane %v2359_v13, 4  ;;  %v490_v14 = vrot.slane %v2368_v21, 1 }
  0x6c   : >> { %v440_v55 = vmax.f32 %v408_v48, %v424_v43  ;;  %v560_v56 = vmax.f32 %v515_v50, %v534_v54  ;;  %v587_v57 = vsel %vm570_vm5, %v585_v46, %v586_v51  ;;  %v535_v59 = vrot.slane %v2368_v21, 2  ;;  %v336_v54 = vld [vmem:[%s2242_s20 + $0x79] sm:$0x3] }
  0x6d   : >> { %683 = vst.msk [vmem:[%s2392_s23 + $0x14] sm:$0xff] %vm148_vm0, %v2474_v7  ;;  %v640_v63 = vsel %vm623_vm6, %v638_v53, %v639_v33  ;;  %v491_v62 = vsel %vm476_vm3, %v488_v38, %v490_v14  ;;  %v588_v0 = vrot.slane %v2368_v21, 3  ;;  %v641_v1 = vrot.slane %v2368_v21, 4 }
  0x6e   : >> { %v583_v2 = vrot.slane %v440_v55, 3  ;;  %v636_v3 = vrot.slane %v440_v55, 4  ;;  %v617_v4 = vmax.f32 %v560_v56, %v587_v57  ;;  %v516_v5 = vmax.f32 %v2359_v13, %v491_v62 }
  0x6f   : >> { %v536_v9 = vsel %vm521_vm4, %v533_v45, %v535_v59  ;;  %v589_v10 = vsel %vm570_vm5, %v586_v51, %v588_v0  ;;  %v642_v28 = vsel %vm623_vm6, %v639_v33, %v641_v1  ;;  %v348_v11 = vmax.f32 %v316_v60, %v332_v61 }
  0x70   : >> { %v584_v12 = vsel %vm570_vm5, %v581_v6, %v583_v2  ;;  %v637_v15 = vsel %vm623_vm6, %v634_v18, %v636_v3  ;;  %v2499_v16 = vmax.f32 %v617_v4, %v640_v63  ;;  %v561_v17 = vmax.f32 %v516_v5, %v536_v9  ;;  %v368_v63 = vld [vmem:[%s2242_s20 + $0x7a] sm:$0x3] }
  0x71   : >> { %v616_v13 = vmax.f32 %v559_v27, %v584_v12  ;;  %v380_v20 = vmax.f32 %v348_v11, %v364_v8  ;;  %v517_v22 = vmax.f32 %v2368_v21, %v490_v14  ;;  %v492_v23 = vrot.slane %v2388_v37, 1  ;;  %v400_v9 = vld [vmem:[%s2242_s20 + $0x7b] sm:$0x3] }
  0x72   : >> { %685 = vst.msk [vmem:[%s2392_s23 + $0x1c] sm:$0xf0] %vm677_vm7, %v2499_v16  ;;  %v618_v24 = vmax.f32 %v561_v17, %v589_v10  ;;  %v493_v6 = vrot.slane %v2406_v47, 1  ;;  %v537_v18 = vrot.slane %v2388_v37, 2  ;;  %v538_v29 = vrot.slane %v2406_v47, 2 }
  0x73   : >> { %v2511_v30 = vmax.f32 %v616_v13, %v637_v15  ;;  %v412_v31 = vmax.f32 %v380_v20, %v396_v19  ;;  %v562_v32 = vmax.f32 %v517_v22, %v535_v59  ;;  %v592_v21 = vrot.slane %v2388_v37, 3  ;;  %v432_v15 = vld [vmem:[%s2242_s20 + $0x7c] sm:$0x3] }
  0x74   : >> { %v2514_v26 = vmax.f32 %v618_v24, %v642_v28  ;;  %v494_v36 = vsel %vm476_vm3, %v492_v23, %v493_v6  ;;  %v539_v35 = vsel %vm521_vm4, %v537_v18, %v538_v29  ;;  %v593_v38 = vrot.slane %v2406_v47, 3 }
  0x75   : >> { %684 = vst.msk [vmem:[%s2392_s23 + $0x1c] sm:$0xf] %vm680_vm8, %v2511_v30  ;;  %v444_v42 = vmax.f32 %v412_v31, %v428_v49  ;;  %v518_v27 = vmax.f32 %v2388_v37, %v494_v36  ;;  %v645_v40 = vrot.slane %v2388_v37, 4  ;;  %v646_v41 = vrot.slane %v2406_v47, 4  ;;  %v320_v37 = vld [vmem:[%s2242_s20 + $0x78] sm:$0x3] }
  0x76   : >> { %686 = vst.msk [vmem:[%s2392_s23 + $0x24] sm:$0xff] %vm148_vm0, %v2514_v26  ;;  %v594_v43 = vsel %vm570_vm5, %v592_v21, %v593_v38  ;;  %v495_v44 = vrot.slane %v2410_v52, 1  ;;  %v540_v45 = vrot.slane %v2410_v52, 2  ;;  %v595_v46 = vrot.slane %v2410_v52, 3 }
  0x77   : >> { %v590_v48 = vrot.slane %v444_v42, 3  ;;  %v643_v50 = vrot.slane %v444_v42, 4  ;;  %v563_v51 = vmax.f32 %v518_v27, %v539_v35  ;;  %v647_v53 = vsel %vm623_vm6, %v645_v40, %v646_v41 }
  0x78   : >> { %v496_v33 = vsel %vm476_vm3, %v493_v6, %v495_v44  ;;  %v541_v14 = vsel %vm521_vm4, %v538_v29, %v540_v45  ;;  %v596_v55 = vsel %vm570_vm5, %v593_v38, %v595_v46  ;;  %v648_v56 = vrot.slane %v2410_v52, 4 }
  0x79   : >> { %v591_v57 = vsel %vm570_vm5, %v588_v0, %v590_v48  ;;  %v644_v59 = vsel %vm623_vm6, %v641_v1, %v643_v50  ;;  %v620_v60 = vmax.f32 %v563_v51, %v594_v43  ;;  %v519_v61 = vmax.f32 %v2406_v47, %v496_v33 }
  0x7a   : >> { %v619_v62 = vmax.f32 %v562_v32, %v591_v57  ;;  %v649_v2 = vsel %vm623_vm6, %v646_v41, %v648_v56  ;;  %v352_v3 = vmax.f32 %v320_v37, %v336_v54  ;;  %v520_v4 = vmax.f32 %v2410_v52, %v495_v44 }
  0x7b   : >> { %v2547_v5 = vmax.f32 %v620_v60, %v647_v53  ;;  %v564_v8 = vmax.f32 %v519_v61, %v541_v14  ;;  %v703_v0 = vrot.slane %v2371_v25, 1  ;;  %v704_v1 = vrot.slane %v2423_v58, 1 }
  0x7c   : >> { %v2552_v47 = vmax.f32 %v619_v62, %v644_v59  ;;  %v384_v10 = vmax.f32 %v352_v3, %v368_v63  ;;  %v565_v28 = vmax.f32 %v520_v4, %v540_v45  ;;  %v747_v11 = vrot.slane %v2371_v25, 2 }
  0x7d   : >> { %688 = vst.msk [vmem:[%s2392_s23 + $0x2c] sm:$0xf0] %vm677_vm7, %v2547_v5  ;;  %v621_v12 = vmax.f32 %v564_v8, %v596_v55  ;;  %v705_v17 = vsel %vm476_vm3, %v703_v0, %v704_v1  ;;  %v748_v19 = vrot.slane %v2423_v58, 2  ;;  %v791_v13 = vrot.slane %v2371_v25, 3 }
  0x7e   : >> { %687 = vst.msk [vmem:[%s2392_s23 + $0x2c] sm:$0xf] %vm680_vm8, %v2552_v47  ;;  %v416_v20 = vmax.f32 %v384_v10, %v400_v9  ;;  %v735_v22 = vmax.f32 %v2371_v25, %v705_v17  ;;  %v792_v23 = vrot.slane %v2423_v58, 3  ;;  %v835_v24 = vrot.slane %v2371_v25, 4 }
  0x7f   : >> { %v2568_v49 = vmax.f32 %v621_v12, %v649_v2  ;;  %v749_v6 = vsel %vm521_vm4, %v747_v11, %v748_v19  ;;  %v836_v18 = vrot.slane %v2423_v58, 4  ;;  %v706_v29 = vrot.slane %v2458_v39, 1 }
  0x80   : >> { %v448_v31 = vmax.f32 %v416_v20, %v432_v15  ;;  %v779_v32 = vmax.f32 %v735_v22, %v749_v6  ;;  %v793_v21 = vsel %vm570_vm5, %v791_v13, %v792_v23  ;;  %v750_v36 = vrot.slane %v2458_v39, 2 }
  0x81   : >> { %689 = vst.msk [vmem:[%s2392_s23 + $0x34] sm:$0xff] %vm148_vm0, %v2568_v49  ;;  %v837_v25 = vsel %vm623_vm6, %v835_v24, %v836_v18  ;;  %v707_v35 = vsel %vm476_vm3, %v704_v1, %v706_v29  ;;  %v794_v38 = vrot.slane %v2458_v39, 3  ;;  %v838_v42 = vrot.slane %v2458_v39, 4 }
  0x82   : >> { %v597_v27 = vrot.slane %v448_v31, 3  ;;  %v650_v40 = vrot.slane %v448_v31, 4  ;;  %v823_v41 = vmax.f32 %v779_v32, %v793_v21  ;;  %v736_v43 = vmax.f32 %v2423_v58, %v707_v35 }
  0x83   : >> { %v751_v44 = vsel %vm521_vm4, %v748_v19, %v750_v36  ;;  %v795_v45 = vsel %vm570_vm5, %v792_v23, %v794_v38  ;;  %v839_v48 = vsel %vm623_vm6, %v836_v18, %v838_v42  ;;  %v737_v50 = vmax.f32 %v2458_v39, %v706_v29 }
  0x84   : >> { %v598_v51 = vsel %vm570_vm5, %v595_v46, %v597_v27  ;;  %v651_v53 = vsel %vm623_vm6, %v648_v56, %v650_v40  ;;  %v867_v37 = vmax.f32 %v823_v41, %v837_v25  ;;  %v780_v54 = vmax.f32 %v736_v43, %v751_v44 }
  0x85   : >> { %v622_v33 = vmax.f32 %v565_v28, %v598_v51  ;;  %v781_v14 = vmax.f32 %v737_v50, %v750_v36  ;;  %v708_v58 = vrot.slane %v2453_v34, 1  ;;  %v709_v55 = vrot.slane %v2474_v7, 1 }
  0x86   : >> { %881 = vst.msk [vmem:[%s2594_s24 - $0x2] sm:$0xfc] %vm880_vm9, %v867_v37  ;;  %v824_v39 = vmax.f32 %v780_v54, %v795_v45  ;;  %v752_v52 = vrot.slane %v2453_v34, 2  ;;  %v753_v46 = vrot.slane %v2474_v7, 2  ;;  %v796_v56 = vrot.slane %v2453_v34, 3 }
  0x87   : >> { %v2601_v57 = vmax.f32 %v622_v33, %v651_v53  ;;  %v825_v59 = vmax.f32 %v781_v14, %v794_v38  ;;  %v710_v60 = vsel %vm476_vm3, %v708_v58, %v709_v55  ;;  %v797_v61 = vrot.slane %v2474_v7, 3 }
  0x88   : >> { %v868_v63 = vmax.f32 %v824_v39, %v839_v48  ;;  %v738_v62 = vmax.f32 %v2453_v34, %v710_v60  ;;  %v754_v2 = vsel %vm521_vm4, %v752_v52, %v753_v46  ;;  %v840_v3 = vrot.slane %v2453_v34, 4 }
  0x89   : >> { %690 = vst.msk [vmem:[%s2392_s23 + $0x3c] sm:$0xf] %vm680_vm8, %v2601_v57  ;;  %v869_v4 = vmax.f32 %v825_v59, %v838_v42  ;;  %v798_v8 = vsel %vm570_vm5, %v796_v56, %v797_v61  ;;  %v841_v9 = vrot.slane %v2474_v7, 4  ;;  %v711_v0 = vrot.slane %v2511_v30, 1 }
  0x8a   : >> { %882 = vst.msk [vmem:[%s2594_s24 + $0x6] sm:$0xff] %vm148_vm0, %v868_v63  ;;  %v782_v1 = vmax.f32 %v738_v62, %v754_v2  ;;  %v755_v10 = vrot.slane %v2511_v30, 2  ;;  %v799_v28 = vrot.slane %v2511_v30, 3  ;;  %v843_v11 = vrot.slane %v2511_v30, 4 }
  0x8b   : >> { %884 = vst.msk [vmem:[%s2594_s24 + $0xe] sm:$0x3] %vm883_vm10, %v869_v4  ;;  %v842_v34 = vsel %vm623_vm6, %v840_v3, %v841_v9  ;;  %v712_v12 = vsel %vm476_vm3, %v709_v55, %v711_v0  ;;  %v740_v15 = vmax.f32 %v2511_v30, %v711_v0  ;;  %v713_v17 = vrot.slane %v2499_v16, 1 }
  0x8c   : >> { %v826_v19 = vmax.f32 %v782_v1, %v798_v8  ;;  %v739_v13 = vmax.f32 %v2474_v7, %v712_v12  ;;  %v756_v20 = vsel %vm521_vm4, %v753_v46, %v755_v10  ;;  %v800_v22 = vsel %vm570_vm5, %v797_v61, %v799_v28 }
  0x8d   : >> { %v844_v23 = vsel %vm623_vm6, %v841_v9, %v843_v11  ;;  %v784_v24 = vmax.f32 %v740_v15, %v755_v10  ;;  %v714_v6 = vrot.slane %v2514_v26, 1  ;;  %v757_v18 = vrot.slane %v2499_v16, 2 }
  0x8e   : >> { %v870_v29 = vmax.f32 %v826_v19, %v842_v34  ;;  %v783_v31 = vmax.f32 %v739_v13, %v756_v20  ;;  %v758_v30 = vrot.slane %v2514_v26, 2  ;;  %v801_v32 = vrot.slane %v2499_v16, 3 }
  0x8f   : >> { %v828_v21 = vmax.f32 %v784_v24, %v799_v28  ;;  %v715_v7 = vsel %vm476_vm3, %v713_v17, %v714_v6  ;;  %v802_v36 = vrot.slane %v2514_v26, 3  ;;  %v845_v25 = vrot.slane %v2499_v16, 4 }
  0x90   : >> { %885 = vst.msk [vmem:[%s2594_s24 + $0xe] sm:$0xfc] %vm880_vm9, %v870_v29  ;;  %v827_v35 = vmax.f32 %v783_v31, %v800_v22  ;;  %v741_v38 = vmax.f32 %v2499_v16, %v715_v7  ;;  %v759_v42 = vsel %vm521_vm4, %v757_v18, %v758_v30  ;;  %v846_v27 = vrot.slane %v2514_v26, 4 }
  0x91   : >> { %v872_v40 = vmax.f32 %v828_v21, %v843_v11  ;;  %v803_v41 = vsel %vm570_vm5, %v801_v32, %v802_v36  ;;  %v716_v43 = vrot.slane %v2552_v47, 1  ;;  %v760_v44 = vrot.slane %v2552_v47, 2 }
  0x92   : >> { %v871_v45 = vmax.f32 %v827_v35, %v844_v23  ;;  %v785_v48 = vmax.f32 %v741_v38, %v759_v42  ;;  %v847_v50 = vsel %vm623_vm6, %v845_v25, %v846_v27  ;;  %v804_v51 = vrot.slane %v2552_v47, 3 }
  0x93   : >> { %887 = vst.msk [vmem:[%s2594_s24 + $0x1e] sm:$0x3] %vm883_vm10, %v872_v40  ;;  %v717_v16 = vsel %vm476_vm3, %v714_v6, %v716_v43  ;;  %v761_v53 = vsel %vm521_vm4, %v758_v30, %v760_v44  ;;  %v848_v37 = vrot.slane %v2552_v47, 4  ;;  %v743_v54 = vmax.f32 %v2552_v47, %v716_v43 }
  0x94   : >> { %886 = vst.msk [vmem:[%s2594_s24 + $0x16] sm:$0xff] %vm148_vm0, %v871_v45  ;;  %v829_v33 = vmax.f32 %v785_v48, %v803_v41  ;;  %v742_v14 = vmax.f32 %v2514_v26, %v717_v16  ;;  %v805_v58 = vsel %vm570_vm5, %v802_v36, %v804_v51  ;;  %v718_v55 = vrot.slane %v2547_v5, 1 }
  0x95   : >> { %v849_v39 = vsel %vm623_vm6, %v846_v27, %v848_v37  ;;  %v787_v52 = vmax.f32 %v743_v54, %v760_v44  ;;  %v719_v46 = vrot.slane %v2568_v49, 1  ;;  %v762_v56 = vrot.slane %v2547_v5, 2 }
  0x96   : >> { %v873_v59 = vmax.f32 %v829_v33, %v847_v50  ;;  %v786_v60 = vmax.f32 %v742_v14, %v761_v53  ;;  %v763_v47 = vrot.slane %v2568_v49, 2  ;;  %v806_v61 = vrot.slane %v2547_v5, 3 }
  0x97   : >> { %v831_v63 = vmax.f32 %v787_v52, %v804_v51  ;;  %v720_v26 = vsel %vm476_vm3, %v718_v55, %v719_v46  ;;  %v807_v62 = vrot.slane %v2568_v49, 3  ;;  %v850_v2 = vrot.slane %v2547_v5, 4 }
  0x98   : >> { %888 = vst.msk [vmem:[%s2594_s24 + $0x1e] sm:$0xfc] %vm880_vm9, %v873_v59  ;;  %v830_v3 = vmax.f32 %v786_v60, %v805_v58  ;;  %v744_v4 = vmax.f32 %v2547_v5, %v720_v26  ;;  %v764_v8 = vsel %vm521_vm4, %v762_v56, %v763_v47  ;;  %v851_v9 = vrot.slane %v2568_v49, 4 }
  0x99   : >> { %v875_v0 = vmax.f32 %v831_v63, %v848_v37  ;;  %v808_v1 = vsel %vm570_vm5, %v806_v61, %v807_v62  ;;  %v721_v10 = vrot.slane %v2601_v57, 1  ;;  %v765_v28 = vrot.slane %v2601_v57, 2 }
  0x9a   : >> { %v874_v11 = vmax.f32 %v830_v3, %v849_v39  ;;  %v788_v34 = vmax.f32 %v744_v4, %v764_v8  ;;  %v852_v12 = vsel %vm623_vm6, %v850_v2, %v851_v9  ;;  %v809_v15 = vrot.slane %v2601_v57, 3 }
  0x9b   : >> { %890 = vst.msk [vmem:[%s2594_s24 + $0x2e] sm:$0x3] %vm883_vm10, %v875_v0  ;;  %v722_v5 = vsel %vm476_vm3, %v719_v46, %v721_v10  ;;  %v766_v17 = vsel %vm521_vm4, %v763_v47, %v765_v28  ;;  %v853_v19 = vrot.slane %v2601_v57, 4  ;;  %v746_v13 = vmax.f32 %v2601_v57, %v721_v10 }
  0x9c   : >> { %889 = vst.msk [vmem:[%s2594_s24 + $0x26] sm:$0xff] %vm148_vm0, %v874_v11  ;;  %v832_v20 = vmax.f32 %v788_v34, %v808_v1  ;;  %v745_v22 = vmax.f32 %v2568_v49, %v722_v5  ;;  %v810_v23 = vsel %vm570_vm5, %v807_v62, %v809_v15 }
  0x9d   : >> { %v790_v24 = vmax.f32 %v746_v13, %v765_v28  ;;  %v854_v29 = vsel %vm623_vm6, %v851_v9, %v853_v19 }
  0x9e   : >> { %v876_v6 = vmax.f32 %v832_v20, %v852_v12  ;;  %v789_v18 = vmax.f32 %v745_v22, %v766_v17  ;;  %300 = sbr.rel (!%p298_p5) target bundleno = 63 (0x3f), region = 106 }
  0x9f   : >> { %v834_v31 = vmax.f32 %v790_v24, %v809_v15 }
  0xa0   : >> { %891 = vst.msk [vmem:[%s2594_s24 + $0x2e] sm:$0xfc] %vm880_vm9, %v876_v6  ;;  %v833_v30 = vmax.f32 %v789_v18, %v810_v23 }
  0xa1   : >> { %v878_v32 = vmax.f32 %v834_v31, %v853_v19 }
  0xa2   : >> { %v877_v21 = vmax.f32 %v833_v30, %v854_v29 }
  0xa3   : >> { %893 = vst.msk [vmem:[%s2594_s24 + $0x3e] sm:$0x3] %vm883_vm10, %v878_v32 }
  0xa4   : >> { %892 = vst.msk [vmem:[%s2594_s24 + $0x36] sm:$0xff] %vm148_vm0, %v877_v21 }
  0xa5 LB: >> { %s1617_s26 = sshll.u32 %s1965_s25, 2  ;;  %s899_s25 = sadd.s32 1, %s1965_s25   ;;  %s1965_s25 = sphi %s2695_s25, %s899_s25  }
  0xa6   : >> { %p901_p6 = scmp.lt.s32.totalorder %s1617_s26, 12  ;;  %p896_p7 = scmp.ge.s32.totalorder %s899_s25, 4  }
  0xa8   : >> { %s3002_s26 = smov (!%p901_p6, %s1617_s26), 12 }
  0xa9   : >> { %s2701_s27 = sshll.u32 %s3002_s26, 4 }
  0xaa   : >> { %s2704_s28 = scalar_lea.vmem [#allocation5], %s2701_s27  ;;  %s2824_s29 = scalar_lea.vmem %s2170_s17, %s2701_s27 }
  0xab   : >> { %v905_v49 = vld [vmem:[%s2704_s28] sm:$0xff]  ;;  %v1620_v57 = vld [vmem:[%s2704_s28 + $0x10] sm:$0xff]  ;;  %v906_v16 = vld [vmem:[%s2704_s28 + $0x8] sm:$0xff]  ;;  %s2832_s30 = scalar_lea.vmem [#allocation4], %s2701_s27  ;;  %s2838_s2 = scalar_lea.vmem %s2165_s14, %s2701_s27 }
  0xac   : >> { %v2709_v7 = vld [vmem:[%s2704_s28 + $0x20] sm:$0xff]  ;;  %v924_v36 = vmax.f32 %v905_v49, %v1620_v57  ;;  %v2712_v25 = vld [vmem:[%s2704_s28 + $0x30] sm:$0xff]  ;;  %v1621_v53 = vld [vmem:[%s2704_s28 + $0x18] sm:$0xff]  ;;  %s2927_s3 = scalar_lea.vmem [#allocation3], %s2701_s27 }
  0xad   : >> { %v2715_v35 = vld [vmem:[%s2704_s28 + $0x40] sm:$0xff]  ;;  %v1656_v38 = vld [vmem:[%s2704_s28 + $0x50] sm:$0xff]  ;;  %v926_v42 = vmax.f32 %v1620_v57, %v2709_v7  ;;  %v928_v37 = vmax.f32 %v2709_v7, %v2712_v25  ;;  %v925_v58 = vmax.f32 %v906_v16, %v1621_v53  ;;  %v1630_v55 = vld [vmem:[%s2704_s28 + $0x28] sm:$0xff] }
  0xae   : >> { %v947_v27 = vmax.f32 %v1656_v38, %v2715_v35  ;;  %v1665_v40 = vld [vmem:[%s2704_s28 + $0x60] sm:$0xff]  ;;  %v2722_v41 = vld [vmem:[%s2704_s28 + $0x70] sm:$0xff]  ;;  %v943_v43 = vmax.f32 %v924_v36, %v2709_v7  ;;  %v930_v54 = vmax.f32 %v2712_v25, %v2715_v35  ;;  %v2742_v39 = vld [vmem:[%s2704_s28 + $0x38] sm:$0xff]  ;;  %v927_v61 = vmax.f32 %v1621_v53, %v1630_v55 }
  0xaf   : >> { %v949_v44 = vmax.f32 %v1665_v40, %v1656_v38  ;;  %v2726_v45 = vld [vmem:[%s2704_s28 + $0x80] sm:$0xff]  ;;  %v945_v48 = vmax.f32 %v926_v42, %v2712_v25  ;;  %v2730_v51 = vld [vmem:[%s2704_s28 + $0x90] sm:$0xff]  ;;  %v2745_v52 = vld [vmem:[%s2704_s28 + $0x48] sm:$0xff]  ;;  %v929_v63 = vmax.f32 %v1630_v55, %v2742_v39  ;;  %v944_v3 = vmax.f32 %v925_v58, %v1630_v55 }
  0xb0   : >> { %v966_v50 = vmax.f32 %v947_v27, %v1665_v40  ;;  %v962_v33 = vmax.f32 %v943_v43, %v2712_v25  ;;  %v1657_v59 = vld [vmem:[%s2704_s28 + $0x58] sm:$0xff]  ;;  %v1666_v60 = vld [vmem:[%s2704_s28 + $0x68] sm:$0xff]  ;;  %v931_v26 = vmax.f32 %v2742_v39, %v2745_v52  ;;  %v1701_v9 = vld [vmem:[%s2704_s28 + $0xa0] sm:$0xff]  ;;  %v946_v10 = vmax.f32 %v927_v61, %v2742_v39 }
  0xb1   : >> { %v968_v14 = vmax.f32 %v949_v44, %v2722_v41  ;;  %v964_v46 = vmax.f32 %v945_v48, %v2715_v35  ;;  %v2752_v47 = vld [vmem:[%s2704_s28 + $0x78] sm:$0xff]  ;;  %v950_v4 = vmax.f32 %v1666_v60, %v1657_v59  ;;  %v1684_v0 = vld [vmem:[%s2704_s28 + $0x88] sm:$0xff]  ;;  %v948_v28 = vmax.f32 %v929_v63, %v2745_v52  ;;  %v2769_v17 = vld [vmem:[%s2704_s28 + $0xb0] sm:$0xff] }
  0xb2   : >> { %v985_v56 = vmax.f32 %v966_v50, %v2722_v41  ;;  %v981_v62 = vmax.f32 %v962_v33, %v2715_v35  ;;  %v963_v12 = vmax.f32 %v944_v3, %v2742_v39  ;;  %v2772_v19 = vld [vmem:[%s2704_s28 + $0x98] sm:$0xff]  ;;  %v965_v20 = vmax.f32 %v946_v10, %v2745_v52  ;;  %v2777_v31 = vld [vmem:[%s2704_s28 + $0xc0] sm:$0xff]  ;;  %v2780_v30 = vld [vmem:[%s2704_s28 + $0xa8] sm:$0xff] }
  0xb3   : >> { %v987_v2 = vmax.f32 %v968_v14, %v2726_v45  ;;  %v983_v1 = vmax.f32 %v964_v46, %v1656_v38  ;;  %v969_v15 = vmax.f32 %v950_v4, %v2752_v47  ;;  %v967_v22 = vmax.f32 %v948_v28, %v1657_v59  ;;  %v1721_v44 = vld [vmem:[%s2704_s28 + $0xd0] sm:$0xff]  ;;  %v2798_v58 = vld [vmem:[%s2704_s28 + $0xc8] sm:$0xff]  ;;  %v2807_v4 = vld [vmem:[%s2704_s28 + $0xd8] sm:$0xff] }
  0xb4   : >> { %v1004_v8 = vmax.f32 %v985_v56, %v2726_v45  ;;  %v1000_v11 = vmax.f32 %v981_v62, %v1656_v38  ;;  %v982_v6 = vmax.f32 %v963_v12, %v2745_v52  ;;  %v984_v21 = vmax.f32 %v965_v20, %v1657_v59  ;;  %v1723_v56 = vld [vmem:[%s2704_s28 + $0xe0] sm:$0xff] }
  0xb5   : >> { %v1006_v34 = vmax.f32 %v987_v2, %v2730_v51  ;;  %v1002_v13 = vmax.f32 %v983_v1, %v1665_v40  ;;  %v988_v18 = vmax.f32 %v969_v15, %v1684_v0  ;;  %v986_v49 = vmax.f32 %v967_v22, %v1666_v60  ;;  %v2818_v15 = vld [vmem:[%s2704_s28 + $0xe8] sm:$0xff]  ;;  %v1728_v7 = vld [vmem:[%s2832_s30 + $0x20] sm:$0xff] }
  0xb6   : >> { %v1023_v5 = vmax.f32 %v1004_v8, %v2730_v51  ;;  %v1019_v23 = vmax.f32 %v1000_v11, %v1665_v40  ;;  %v1001_v38 = vmax.f32 %v982_v6, %v1657_v59  ;;  %v2788_v40 = vld [vmem:[%s2704_s28 + $0xb8] sm:$0xff]  ;;  %v1003_v48 = vmax.f32 %v984_v21, %v1666_v60  ;;  %v1729_v22 = vld [vmem:[%s2832_s30 + $0x28] sm:$0xff] }
  0xb7   : >> { %v1025_v24 = vmax.f32 %v1006_v34, %v1701_v9  ;;  %v1021_v32 = vmax.f32 %v1002_v13, %v2722_v41  ;;  %v1007_v42 = vmax.f32 %v988_v18, %v2772_v19  ;;  %v1005_v50 = vmax.f32 %v986_v49, %v2752_v47  ;;  %v2853_v21 = vld [vmem:[%s2832_s30 + $0x48] sm:$0xff] }
  0xb8   : >> { %v1042_v29 = vmax.f32 %v1023_v5, %v1701_v9  ;;  %v1038_v57 = vmax.f32 %v1019_v23, %v2722_v41  ;;  %v1020_v53 = vmax.f32 %v1001_v38, %v1666_v60  ;;  %v1022_v46 = vmax.f32 %v1003_v48, %v2752_v47  ;;  %v1725_v5 = vld [vmem:[%s2704_s28 + $0xf0] sm:$0xff]  ;;  %v1738_v23 = vld [vmem:[%s2832_s30 + $0x38] sm:$0xff]  ;;  %v1393_v38 = vld [vmem:[%s2838_s2] sm:$0xff] }
  0xb9   : >> { %v1044_v36 = vmax.f32 %v1025_v24, %v2769_v17  ;;  %v1040_v43 = vmax.f32 %v1021_v32, %v2726_v45  ;;  %v1026_v33 = vmax.f32 %v1007_v42, %v2780_v30  ;;  %v1024_v59 = vmax.f32 %v1005_v50, %v1684_v0  ;;  %v1726_v32 = vld [vmem:[%s2704_s28 + $0xf8] sm:$0xff]  ;;  %v1394_v42 = vld [vmem:[%s2838_s2 + $0x8] sm:$0xff]  ;;  %1872 = vst.msk [vmem:[%s2824_s29 + $0x300] sm:$0xff] %vm148_vm0, %v1393_v38  ;;  %v1802_v38 = vld [vmem:[%s2832_s30 + $0xb0] sm:$0xff] }
  0xba   : >> { %v1061_v27 = vmax.f32 %v1042_v29, %v2769_v17  ;;  %v1057_v16 = vmax.f32 %v1038_v57, %v2726_v45  ;;  %v1039_v45 = vmax.f32 %v1020_v53, %v2752_v47  ;;  %v1041_v3 = vmax.f32 %v1022_v46, %v1684_v0  ;;  %1873 = vst.msk [vmem:[%s2824_s29 + $0x308] sm:$0xff] %vm148_vm0, %v1394_v42  ;;  %v1756_v53 = vld [vmem:[%s2832_s30 + $0x58] sm:$0xff] }
  0xbb   : >> { %v1063_v41 = vmax.f32 %v1044_v36, %v2777_v31  ;;  %v1059_v55 = vmax.f32 %v1040_v43, %v2730_v51  ;;  %v1045_v63 = vmax.f32 %v1026_v33, %v2788_v40  ;;  %v1043_v8 = vmax.f32 %v1024_v59, %v2772_v19  ;;  %v1755_v36 = vld [vmem:[%s2832_s30 + $0x50] sm:$0xff]  ;;  %v1764_v59 = vld [vmem:[%s2832_s30 + $0x60] sm:$0xff] }
  0xbc   : >> { %v1080_v14 = vmax.f32 %v1061_v27, %v2777_v31  ;;  %v1076_v61 = vmax.f32 %v1057_v16, %v2730_v51  ;;  %v1058_v10 = vmax.f32 %v1039_v45, %v1684_v0  ;;  %v1060_v11 = vmax.f32 %v1041_v3, %v2772_v19  ;;  %v1395_v27 = vld [vmem:[%s2838_s2 + $0x10] sm:$0xff]  ;;  %v1397_v16 = vld [vmem:[%s2838_s2 + $0x20] sm:$0xff]  ;;  %v1765_v45 = vld [vmem:[%s2832_s30 + $0x68] sm:$0xff] }
  0xbd   : >> { %v1082_v60 = vmax.f32 %v1063_v41, %v1721_v44  ;;  %v1078_v62 = vmax.f32 %v1059_v55, %v1701_v9  ;;  %v1064_v51 = vmax.f32 %v1045_v63, %v2798_v58  ;;  %v1062_v12 = vmax.f32 %v1043_v8, %v2780_v30  ;;  %1874 = vst.msk [vmem:[%s2824_s29 + $0x310] sm:$0xff] %vm148_vm0, %v1395_v27  ;;  %v1398_v41 = vld [vmem:[%s2838_s2 + $0x28] sm:$0xff]  ;;  %v1400_v55 = vld [vmem:[%s2838_s2 + $0x38] sm:$0xff]  ;;  %v1773_v3 = vld [vmem:[%s2832_s30 + $0x70] sm:$0xff] }
  0xbe   : >> { %v1099_v2 = vmax.f32 %v1080_v14, %v1721_v44  ;;  %v1095_v1 = vmax.f32 %v1076_v61, %v1701_v9  ;;  %v1077_v0 = vmax.f32 %v1058_v10, %v2772_v19  ;;  %v1079_v19 = vmax.f32 %v1060_v11, %v2780_v30  ;;  %1876 = vst.msk [vmem:[%s2824_s29 + $0x320] sm:$0xff] %vm148_vm0, %v1397_v16  ;;  %v1399_v14 = vld [vmem:[%s2838_s2 + $0x30] sm:$0xff] }
  0xbf   : >> { %v1101_v47 = vmax.f32 %v1082_v60, %v1723_v56  ;;  %v1097_v28 = vmax.f32 %v1078_v62, %v2769_v17  ;;  %v1083_v13 = vmax.f32 %v1064_v51, %v2807_v4  ;;  %v1081_v35 = vmax.f32 %v1062_v12, %v2788_v40  ;;  %1877 = vst.msk [vmem:[%s2824_s29 + $0x328] sm:$0xff] %vm148_vm0, %v1398_v41  ;;  %v1782_v12 = vld [vmem:[%s2832_s30 + $0x80] sm:$0xff] }
  0xc0   : >> { %v1118_v34 = vmax.f32 %v1099_v2, %v928_v37  ;;  %v1114_v9 = vmax.f32 %v1095_v1, %v2769_v17  ;;  %v1737_v37 = vld [vmem:[%s2832_s30 + $0x30] sm:$0xff]  ;;  %v1096_v6 = vmax.f32 %v1077_v0, %v2780_v30  ;;  %v1098_v57 = vmax.f32 %v1079_v19, %v2788_v40  ;;  %1878 = vst.msk [vmem:[%s2824_s29 + $0x330] sm:$0xff] %vm148_vm0, %v1399_v14  ;;  %v1774_v1 = vld [vmem:[%s2832_s30 + $0x78] sm:$0xff]  ;;  %v1818_v41 = vld [vmem:[%s2927_s3 + $0x40] sm:$0xff] }
  0xc1   : >> { %v1120_v20 = vmax.f32 %v1101_v47, %v930_v54  ;;  %v1116_v17 = vmax.f32 %v1097_v28, %v2777_v31  ;;  %v2844_v54 = vld [vmem:[%s2832_s30 + $0x40] sm:$0xff]  ;;  %v1102_v18 = vmax.f32 %v1083_v13, %v2818_v15  ;;  %v1168_v30 = vmax.f32 %v1728_v7, %v1737_v37  ;;  %1879 = vst.msk [vmem:[%s2824_s29 + $0x338] sm:$0xff] %vm148_vm0, %v1400_v55  ;;  %v1791_v19 = vld [vmem:[%s2832_s30 + $0x90] sm:$0xff]  ;;  %v1819_v55 = vld [vmem:[%s2927_s3 + $0x48] sm:$0xff] }
  0xc2   : >> { %v1137_v25 = vmax.f32 %v1118_v34, %v1723_v56  ;;  %v1133_v24 = vmax.f32 %v1114_v9, %v2777_v31  ;;  %v1100_v31 = vmax.f32 %v1081_v35, %v2798_v58  ;;  %v1115_v43 = vmax.f32 %v1096_v6, %v2788_v40  ;;  %v1396_v40 = vld [vmem:[%s2838_s2 + $0x18] sm:$0xff]  ;;  %v1836_v14 = vld [vmem:[%s2927_s3 + $0x60] sm:$0xff] }
  0xc3   : >> { %v1139_v29 = vmax.f32 %v1120_v20, %v1725_v5  ;;  %v1135_v49 = vmax.f32 %v1116_v17, %v1721_v44  ;;  %v1121_v44 = vmax.f32 %v1102_v18, %v931_v26  ;;  %v1169_v48 = vmax.f32 %v1729_v22, %v1738_v23  ;;  %1875 = vst.msk [vmem:[%s2824_s29 + $0x318] sm:$0xff] %vm148_vm0, %v1396_v40  ;;  %v1783_v5 = vld [vmem:[%s2832_s30 + $0x88] sm:$0xff]  ;;  %v1792_v35 = vld [vmem:[%s2832_s30 + $0x98] sm:$0xff] }
  0xc4   : >> { %1146 = vst.msk [vmem:[%s2824_s29 + $0x20] sm:$0xff] %vm148_vm0, %v1137_v25  ;;  %1142 = vst.msk [vmem:[%s2824_s29] sm:$0xff] %vm148_vm0, %v1133_v24  ;;  %v1170_v50 = vmax.f32 %v1737_v37, %v2844_v54  ;;  %v1117_v39 = vmax.f32 %v1098_v57, %v2798_v58  ;;  %v1119_v52 = vmax.f32 %v1100_v31, %v2807_v4 }
  0xc5   : >> { %1148 = vst.msk [vmem:[%s2824_s29 + $0x30] sm:$0xff] %vm148_vm0, %v1139_v29  ;;  %1144 = vst.msk [vmem:[%s2824_s29 + $0x10] sm:$0xff] %vm148_vm0, %v1135_v49  ;;  %v1185_v26 = vmax.f32 %v1168_v30, %v2844_v54  ;;  %v1171_v33 = vmax.f32 %v1738_v23, %v2853_v21  ;;  %v1134_v46 = vmax.f32 %v1115_v43, %v2798_v58  ;;  %v1801_v49 = vld [vmem:[%s2832_s30 + $0xa8] sm:$0xff] }
  0xc6   : >> { %v1140_v56 = vmax.f32 %v1121_v44, %v1726_v32  ;;  %v1186_v61 = vmax.f32 %v1169_v48, %v2853_v21  ;;  %v1187_v63 = vmax.f32 %v1170_v50, %v1755_v36  ;;  %v1136_v60 = vmax.f32 %v1117_v39, %v2807_v4  ;;  %v1800_v32 = vld [vmem:[%s2832_s30 + $0xa0] sm:$0xff]  ;;  %v1803_v50 = vld [vmem:[%s2832_s30 + $0xb8] sm:$0xff]  ;;  %v1827_v39 = vld [vmem:[%s2927_s3 + $0x50] sm:$0xff] }
  0xc7   : >> { %v1138_v62 = vmax.f32 %v1119_v52, %v2818_v15  ;;  %v1202_v2 = vmax.f32 %v1185_v26, %v1755_v36  ;;  %v1188_v58 = vmax.f32 %v1171_v33, %v1756_v53  ;;  %1143 = vst.msk [vmem:[%s2824_s29 + $0x8] sm:$0xff] %vm148_vm0, %v1134_v46  ;;  %v1172_v51 = vmax.f32 %v2844_v54, %v1755_v36  ;;  %v1828_v46 = vld [vmem:[%s2927_s3 + $0x58] sm:$0xff] }
  0xc8   : >> { %1149 = vst.msk [vmem:[%s2824_s29 + $0x38] sm:$0xff] %vm148_vm0, %v1140_v56  ;;  %v1203_v8 = vmax.f32 %v1186_v61, %v1756_v53  ;;  %v1204_v10 = vmax.f32 %v1187_v63, %v1764_v59  ;;  %v1173_v47 = vmax.f32 %v2853_v21, %v1756_v53  ;;  %1145 = vst.msk [vmem:[%s2824_s29 + $0x18] sm:$0xff] %vm148_vm0, %v1136_v60  ;;  %v1805_v60 = vld [vmem:[%s2832_s30 + $0xc8] sm:$0xff] }
  0xc9   : >> { %1147 = vst.msk [vmem:[%s2824_s29 + $0x28] sm:$0xff] %vm148_vm0, %v1138_v62  ;;  %v1219_v4 = vmax.f32 %v1202_v2, %v1764_v59  ;;  %v1205_v28 = vmax.f32 %v1188_v58, %v1765_v45  ;;  %v1174_v11 = vmax.f32 %v1755_v36, %v1764_v59  ;;  %v1175_v34 = vmax.f32 %v1756_v53, %v1765_v45  ;;  %v1837_v62 = vld [vmem:[%s2927_s3 + $0x68] sm:$0xff] }
  0xca   : >> { %v1220_v15 = vmax.f32 %v1203_v8, %v1765_v45  ;;  %v1221_v9 = vmax.f32 %v1204_v10, %v1773_v3  ;;  %v1189_v0 = vmax.f32 %v1172_v51, %v1764_v59  ;;  %v1190_v13 = vmax.f32 %v1173_v47, %v1765_v45  ;;  %v1804_v45 = vld [vmem:[%s2832_s30 + $0xc0] sm:$0xff]  ;;  %v1806_v51 = vld [vmem:[%s2832_s30 + $0xd0] sm:$0xff]  ;;  %v1807_v47 = vld [vmem:[%s2832_s30 + $0xd8] sm:$0xff] }
  0xcb   : >> { %v1236_v20 = vmax.f32 %v1219_v4, %v1773_v3  ;;  %v1222_v7 = vmax.f32 %v1205_v28, %v1774_v1  ;;  %v1191_v37 = vmax.f32 %v1174_v11, %v1773_v3  ;;  %v1192_v17 = vmax.f32 %v1175_v34, %v1774_v1 }
  0xcc   : >> { %v1237_v25 = vmax.f32 %v1220_v15, %v1774_v1  ;;  %v1238_v54 = vmax.f32 %v1221_v9, %v1782_v12  ;;  %v1206_v22 = vmax.f32 %v1189_v0, %v1773_v3  ;;  %v1207_v23 = vmax.f32 %v1190_v13, %v1774_v1  ;;  %v1845_v15 = vld [vmem:[%s2927_s3 + $0x70] sm:$0xff] }
  0xcd   : >> { %v1253_v24 = vmax.f32 %v1236_v20, %v1782_v12  ;;  %v1239_v6 = vmax.f32 %v1222_v7, %v1783_v5  ;;  %v1208_v18 = vmax.f32 %v1191_v37, %v1782_v12  ;;  %v1209_v29 = vmax.f32 %v1192_v17, %v1783_v5  ;;  %v1854_v20 = vld [vmem:[%s2927_s3 + $0x80] sm:$0xff]  ;;  %v1855_v37 = vld [vmem:[%s2927_s3 + $0x88] sm:$0xff] }
  0xce   : >> { %v1254_v21 = vmax.f32 %v1237_v25, %v1783_v5  ;;  %v1255_v57 = vmax.f32 %v1238_v54, %v1791_v19  ;;  %v1223_v31 = vmax.f32 %v1206_v22, %v1782_v12  ;;  %v1224_v30 = vmax.f32 %v1207_v23, %v1783_v5  ;;  %v1846_v5 = vld [vmem:[%s2927_s3 + $0x78] sm:$0xff] }
  0xcf   : >> { %v1270_v36 = vmax.f32 %v1253_v24, %v1791_v19  ;;  %v1256_v42 = vmax.f32 %v1239_v6, %v1792_v35  ;;  %v1225_v27 = vmax.f32 %v1208_v18, %v1791_v19  ;;  %v1226_v43 = vmax.f32 %v1209_v29, %v1792_v35  ;;  %v1856_v24 = vld [vmem:[%s2927_s3 + $0x90] sm:$0xff]  ;;  %v1857_v6 = vld [vmem:[%s2927_s3 + $0x98] sm:$0xff] }
  0xd0   : >> { %v1271_v44 = vmax.f32 %v1254_v21, %v1792_v35  ;;  %v1272_v48 = vmax.f32 %v1255_v57, %v1800_v32  ;;  %v1240_v40 = vmax.f32 %v1223_v31, %v1791_v19  ;;  %v1241_v16 = vmax.f32 %v1224_v30, %v1792_v35 }
  0xd1   : >> { %v1287_v52 = vmax.f32 %v1270_v36, %v1800_v32  ;;  %v1273_v26 = vmax.f32 %v1256_v42, %v1801_v49  ;;  %v1242_v53 = vmax.f32 %v1225_v27, %v1800_v32  ;;  %v1243_v33 = vmax.f32 %v1226_v43, %v1801_v49  ;;  %v1859_v27 = vld [vmem:[%s2927_s3 + $0xa8] sm:$0xff] }
  0xd2   : >> { %v1288_v56 = vmax.f32 %v1271_v44, %v1801_v49  ;;  %v1289_v59 = vmax.f32 %v1272_v48, %v1802_v38  ;;  %v1257_v61 = vmax.f32 %v1240_v40, %v1800_v32  ;;  %v1258_v63 = vmax.f32 %v1241_v16, %v1801_v49  ;;  %v1860_v16 = vld [vmem:[%s2927_s3 + $0xb0] sm:$0xff] }
  0xd3   : >> { %1809 = vst.msk [vmem:[%s2824_s29 + $0x100] sm:$0xff] %vm148_vm0, %v1287_v52  ;;  %v1290_v2 = vmax.f32 %v1273_v26, %v1803_v50  ;;  %v1259_v58 = vmax.f32 %v1242_v53, %v1802_v38  ;;  %v1260_v3 = vmax.f32 %v1243_v33, %v1803_v50  ;;  %v1323_v8 = vmax.f32 %v1818_v41, %v1827_v39  ;;  %v1861_v41 = vld [vmem:[%s2927_s3 + $0xb8] sm:$0xff] }
  0xd4   : >> { %1810 = vst.msk [vmem:[%s2824_s29 + $0x108] sm:$0xff] %vm148_vm0, %v1288_v56  ;;  %1811 = vst.msk [vmem:[%s2824_s29 + $0x110] sm:$0xff] %vm148_vm0, %v1289_v59  ;;  %v1274_v1 = vmax.f32 %v1257_v61, %v1802_v38  ;;  %v1275_v10 = vmax.f32 %v1258_v63, %v1803_v50  ;;  %v1324_v4 = vmax.f32 %v1819_v55, %v1828_v46  ;;  %v1858_v38 = vld [vmem:[%s2927_s3 + $0xa0] sm:$0xff] }
  0xd5   : >> { %v1325_v28 = vmax.f32 %v1827_v39, %v1836_v14  ;;  %1812 = vst.msk [vmem:[%s2824_s29 + $0x118] sm:$0xff] %vm148_vm0, %v1290_v2  ;;  %v1276_v11 = vmax.f32 %v1259_v58, %v1804_v45  ;;  %v1277_v34 = vmax.f32 %v1260_v3, %v1805_v60  ;;  %v1340_v12 = vmax.f32 %v1323_v8, %v1836_v14 }
  0xd6   : >> { %v1326_v9 = vmax.f32 %v1828_v46, %v1837_v62  ;;  %v1291_v0 = vmax.f32 %v1274_v1, %v1804_v45  ;;  %v1292_v13 = vmax.f32 %v1275_v10, %v1805_v60  ;;  %v1341_v7 = vmax.f32 %v1324_v4, %v1837_v62 }
  0xd7   : >> { %v1342_v17 = vmax.f32 %v1325_v28, %v1845_v15  ;;  %v1293_v19 = vmax.f32 %v1276_v11, %v1806_v51  ;;  %v1294_v25 = vmax.f32 %v1277_v34, %v1807_v47  ;;  %v1357_v35 = vmax.f32 %v1340_v12, %v1845_v15 }
  0xd8   : >> { %v1343_v54 = vmax.f32 %v1326_v9, %v1846_v5  ;;  %1813 = vst.msk [vmem:[%s2824_s29 + $0x120] sm:$0xff] %vm148_vm0, %v1291_v0  ;;  %1814 = vst.msk [vmem:[%s2824_s29 + $0x128] sm:$0xff] %vm148_vm0, %v1292_v13  ;;  %v1358_v22 = vmax.f32 %v1341_v7, %v1846_v5  ;;  %v1327_v18 = vmax.f32 %v1836_v14, %v1845_v15 }
  0xd9   : >> { %v1359_v23 = vmax.f32 %v1342_v17, %v1854_v20  ;;  %v1328_v29 = vmax.f32 %v1837_v62, %v1846_v5  ;;  %1815 = vst.msk [vmem:[%s2824_s29 + $0x130] sm:$0xff] %vm148_vm0, %v1293_v19  ;;  %1816 = vst.msk [vmem:[%s2824_s29 + $0x138] sm:$0xff] %vm148_vm0, %v1294_v25  ;;  %v1374_v32 = vmax.f32 %v1357_v35, %v1854_v20 }
  0xda   : >> { %v1360_v21 = vmax.f32 %v1343_v54, %v1855_v37  ;;  %v1329_v49 = vmax.f32 %v1845_v15, %v1854_v20  ;;  %v1330_v57 = vmax.f32 %v1846_v5, %v1855_v37  ;;  %v1375_v31 = vmax.f32 %v1358_v22, %v1855_v37 }
  0xdb   : >> { %v1376_v30 = vmax.f32 %v1359_v23, %v1856_v24  ;;  %v1344_v36 = vmax.f32 %v1327_v18, %v1854_v20  ;;  %v1345_v42 = vmax.f32 %v1328_v29, %v1855_v37  ;;  %1863 = vst.msk [vmem:[%s2824_s29 + $0x200] sm:$0xff] %vm148_vm0, %v1374_v32 }
  0xdc   : >> { %v1377_v43 = vmax.f32 %v1360_v21, %v1857_v6  ;;  %v1346_v44 = vmax.f32 %v1329_v49, %v1856_v24  ;;  %v1347_v48 = vmax.f32 %v1330_v57, %v1857_v6  ;;  %1864 = vst.msk [vmem:[%s2824_s29 + $0x208] sm:$0xff] %vm148_vm0, %v1375_v31  ;;  %898 = sbr.rel (!%p896_p7) target bundleno = 165 (0xa5), region = 117 }
  0xdd   : >> { %1865 = vst.msk [vmem:[%s2824_s29 + $0x210] sm:$0xff] %vm148_vm0, %v1376_v30  ;;  %v1361_v50 = vmax.f32 %v1344_v36, %v1856_v24  ;;  %v1362_v40 = vmax.f32 %v1345_v42, %v1857_v6 }
  0xde   : >> { %1866 = vst.msk [vmem:[%s2824_s29 + $0x218] sm:$0xff] %vm148_vm0, %v1377_v43  ;;  %v1363_v39 = vmax.f32 %v1346_v44, %v1858_v38  ;;  %v1364_v52 = vmax.f32 %v1347_v48, %v1859_v27 }
  0xdf   : >> { %v1378_v26 = vmax.f32 %v1361_v50, %v1858_v38  ;;  %v1379_v53 = vmax.f32 %v1362_v40, %v1859_v27 }
  0xe0   : >> { %v1380_v33 = vmax.f32 %v1363_v39, %v1860_v16  ;;  %v1381_v14 = vmax.f32 %v1364_v52, %v1861_v41 }
  0xe1   : >> { %1867 = vst.msk [vmem:[%s2824_s29 + $0x220] sm:$0xff] %vm148_vm0, %v1378_v26  ;;  %1868 = vst.msk [vmem:[%s2824_s29 + $0x228] sm:$0xff] %vm148_vm0, %v1379_v53 }
  0xe2   : >> { %1869 = vst.msk [vmem:[%s2824_s29 + $0x230] sm:$0xff] %vm148_vm0, %v1380_v33  ;;  %1870 = vst.msk [vmem:[%s2824_s29 + $0x238] sm:$0xff] %vm148_vm0, %v1381_v14 }
  0xe3 PF: > { %s11_s8 = sadd.s32 1, %s1957_s8   ;;  %s2995_s6 = smov %s1953_s7 }
  0xe4   : > { %p8_p8 = scmp.ge.s32.totalorder %s11_s8, 4   ;;  %s2996_s7 = smov %s2998_s9 }
  0xe6   :  { %10 = sbr.rel (!%p8_p8) target bundleno = 2 (0x2), region = 128 }

</bundles_post_ra>
